<compile_context>
chip_gen: v7x
topology: tpu7x:2x2x1
jax: 0.10.0
libtpu: 0.0.40
codegen_flags: <defaults>
</compile_context>

<pallas_src>
import jax
import jax.numpy as jnp
from jax import lax
from jax.experimental import pallas as pl
from jax.experimental.pallas import tpu as pltpu


# ---------------------------------------------------------------------------
# pass 1: per-(batch, channel) sum / sum-of-squares, tiled over rows of (HW, C).
# The (tiny) per-group reduction + rsqrt is finished in plain JAX in the wrapper.
# ---------------------------------------------------------------------------
def groupnorm_sums_kernel(x_ref, sum_ref, sumsq_ref):
    r = pl.program_id(1)

    @pl.when(r == 0)
    def _():
        sum_ref[...] = jnp.zeros_like(sum_ref)
        sumsq_ref[...] = jnp.zeros_like(sumsq_ref)

    x = x_ref[0].astype(jnp.float32)                         # (tr, C)
    sum_ref[0] += jnp.sum(x, axis=0, keepdims=True)          # (1, C) resident acc
    sumsq_ref[0] += jnp.sum(x * x, axis=0, keepdims=True)


# ---------------------------------------------------------------------------
# pass 2: normalize (affine folded into weights) + fused K/V projection
# ---------------------------------------------------------------------------
def norm_kv_kernel(x_ref, mean_ref, inv_std_ref, w_ref, b_ref, k_ref, v_ref):
    c = k_ref.shape[-1]
    x = x_ref[0].astype(jnp.float32)                         # (tr, C)
    xn = (x - mean_ref[0]) * inv_std_ref[0]                  # gamma/beta folded into W/b
    kv = jnp.dot(xn.astype(jnp.bfloat16), w_ref[...],        # (tr, 2C), one MXU pass
                 preferred_element_type=jnp.float32) + b_ref[...]
    k_ref[0] = kv[:, :c].astype(k_ref.dtype)
    v_ref[0] = kv[:, c:].astype(v_ref.dtype)


# ---------------------------------------------------------------------------
# pass 3: inline q projection + flash attention (online softmax)
#         + output projection + residual
# ---------------------------------------------------------------------------
def flash_attn_proj_kernel(x_ref, mean_ref, inv_std_ref, wq_ref, bq_ref,
                           k_ref, v_ref, wp_ref, bp_ref, out_ref,
                           q_sc, m_sc, l_sc, acc_sc):
    ki = pl.program_id(2)

    @pl.when(ki == 0)
    def _():
        # q projection done once per (b, q-tile); q never touches HBM.
        xn = (x_ref[0].astype(jnp.float32) - mean_ref[0]) * inv_std_ref[0]
        q = jnp.dot(xn.astype(jnp.bfloat16), wq_ref[...],    # gamma/beta/C^-0.5 folded
                    preferred_element_type=jnp.float32) + bq_ref[...]
        q_sc[...] = q.astype(jnp.bfloat16)
        m_sc[...] = jnp.full_like(m_sc, -jnp.inf)
        l_sc[...] = jnp.zeros_like(l_sc)
        acc_sc[...] = jnp.zeros_like(acc_sc)

    # contract on the channel axis of both operands: no explicit k transpose
    s = lax.dot_general(q_sc[...], k_ref[0], (((1,), (1,)), ((), ())),
                        preferred_element_type=jnp.float32)  # (tq, tk) f32

    m_prev = m_sc[...]
    m_new = jnp.maximum(m_prev, jnp.max(s, axis=-1, keepdims=True))
    alpha = jnp.exp(m_prev - m_new)
    p = jnp.exp(s - m_new)                                   # f32 softmax numerator
    l_sc[...] = alpha * l_sc[...] + jnp.sum(p, axis=-1, keepdims=True)
    acc_sc[...] = alpha * acc_sc[...] + jnp.dot(
        p.astype(jnp.bfloat16), v_ref[0], preferred_element_type=jnp.float32)
    m_sc[...] = m_new

    @pl.when(ki == pl.num_programs(2) - 1)
    def _():
        # EUP approx reciprocal (~1e-3 rel err) is well within bf16-matmul noise.
        attn = acc_sc[...] * pl.reciprocal(l_sc[...], approx=True)   # (tq, C)
        proj = jnp.dot(attn.astype(jnp.bfloat16), wp_ref[...],
                       preferred_element_type=jnp.float32) + bp_ref[...]
        out_ref[0] = (x_ref[0].astype(jnp.float32) + proj).astype(out_ref.dtype)


# ---------------------------------------------------------------------------
# wrapper
# ---------------------------------------------------------------------------
def _pick_tile(n, cap):
    """Largest multiple of 8 (sublane) that divides n and is <= cap."""
    cap = max(8, min(n, cap))
    for t in range(cap - cap % 8, 7, -8):
        if n % t == 0:
            return t
    raise ValueError(f"no sublane-aligned tile divides HW={n}")


def _vmem_limit_bytes():
    # v5e/v6e: 128 MiB physical VMEM; v7x: 64 MiB. Leave ~16 MiB headroom for
    # Mosaic internal scratch; floor at the v7x-safe 48 MiB, cap at 100 MiB.
    cap = 64 * 1024 * 1024
    try:
        cap = int(getattr(pltpu.get_tpu_info(), "vmem_capacity_bytes", cap) or cap)
    except Exception:
        pass
    return max(48 * 1024 * 1024, min(cap - 16 * 1024 * 1024, 100 * 1024 * 1024))


def attn_block_forward(x_nchw, params, *, num_groups=32, eps=1e-6,
                       q_tile=512, kv_tile=1024, row_tile=512):
    """x_nchw: (B, C, H, W) float32, matching the PyTorch module interface."""
    B, C, H, W = x_nchw.shape
    HW = H * W
    G = num_groups
    assert C % G == 0
    assert C % 128 == 0, "channel axis must be lane-dense (multiple of 128)"
    # TODO(synk): non-multiple-of-8 spatial sizes would need a padded/masked tail tile.
    assert HW % 8 == 0, "H*W must be a multiple of 8 (sublane constraint)"

    # Defaults (tq=512, tk=1024) keep nq*B >= 2 at realistic VAE sizes so both
    # v7x TensorCores stay busy while halving k/v re-reads vs. smaller tiles.
    tq = _pick_tile(HW, q_tile)
    tk = _pick_tile(HW, kv_tile)
    tr = _pick_tile(HW, row_tile)
    nq, nk, nr = HW // tq, HW // tk, HW // tr

    # NCHW -> (B, HW, C): channels-last so C sits on the 128-lane axis.
    # (If the surrounding model can run channels-last end-to-end, these two
    #  full-tensor transposes — an HBM round trip each — disappear.)
    x = jnp.transpose(x_nchw, (0, 2, 3, 1)).reshape(B, HW, C)

    gamma = params["gamma"].astype(jnp.float32)
    beta = params["beta"].astype(jnp.float32)
    scale = float(C) ** (-0.5)

    # Fold GroupNorm affine and the attention scale into the 1x1-conv weights/
    # biases once at trace time.
    def fold(w, b):                        # w: (Cout, Cin), b: (Cout,)
        return w.T * gamma[:, None], b + w @ beta

    wq_t, bq_f = fold(params["wq"], params["bq"])
    wk_t, bk_f = fold(params["wk"], params["bk"])
    wv_t, bv_f = fold(params["wv"], params["bv"])
    wq_t, bq_f = wq_t * scale, bq_f * scale

    w_q = wq_t.astype(jnp.bfloat16)                                     # (C, C)
    b_q = bq_f.reshape(1, C).astype(jnp.float32)
    w_kv = jnp.concatenate([wk_t, wv_t], axis=1).astype(jnp.bfloat16)   # (C, 2C)
    b_kv = jnp.concatenate([bk_f, bv_f]).reshape(1, 2 * C).astype(jnp.float32)
    wp_t = params["wp"].T.astype(jnp.bfloat16)                          # (C, C)
    bp = params["bp"].reshape(1, C).astype(jnp.float32)

    vmem_limit = _vmem_limit_bytes()

    def cparams(sem):
        return pltpu.CompilerParams(dimension_semantics=sem,
                                    vmem_limit_bytes=vmem_limit)

    # ---- pass 1: per-channel sum / sumsq ------------------------------------
    csum, csumsq = pl.pallas_call(
        groupnorm_sums_kernel,
        out_shape=(jax.ShapeDtypeStruct((B, 1, C), jnp.float32),
                   jax.ShapeDtypeStruct((B, 1, C), jnp.float32)),
        grid=(B, nr),
        in_specs=[pl.BlockSpec((1, tr, C), lambda b, r: (b, r, 0))],
        out_specs=(pl.BlockSpec((1, 1, C), lambda b, r: (b, 0, 0)),
                   pl.BlockSpec((1, 1, C), lambda b, r: (b, 0, 0))),
        compiler_params=cparams(("parallel", "arbitrary")),
    )(x)

    # Finalize group statistics in (tiny) plain JAX — no underfilled one-hot
    # MXU matmuls and no grp/grp_t DMA streams inside the kernel.
    cg = C // G
    n = float(HW * cg)
    mean_g = csum.reshape(B, G, cg).sum(-1) / n                          # (B, G)
    # single-pass variance in f32; clamp guards tiny negative values from
    # cancellation (Welford would be safer for activations with huge DC offsets).
    var_g = jnp.maximum(csumsq.reshape(B, G, cg).sum(-1) / n - mean_g * mean_g, 0.0)
    inv_g = lax.rsqrt(var_g + eps)
    mean = jnp.repeat(mean_g, cg, axis=-1).reshape(B, 1, C)
    inv_std = jnp.repeat(inv_g, cg, axis=-1).reshape(B, 1, C)

    # ---- pass 2: normalize + fused K/V projection ---------------------------
    kv_shape = jax.ShapeDtypeStruct((B, HW, C), jnp.bfloat16)
    k, v = pl.pallas_call(
        norm_kv_kernel,
        out_shape=(kv_shape, kv_shape),
        grid=(B, nr),
        in_specs=[
            pl.BlockSpec((1, tr, C), lambda b, r: (b, r, 0)),   # x
            pl.BlockSpec((1, 1, C), lambda b, r: (b, 0, 0)),    # mean
            pl.BlockSpec((1, 1, C), lambda b, r: (b, 0, 0)),    # inv_std
            pl.BlockSpec((C, 2 * C), lambda b, r: (0, 0)),      # fused W_kv
            pl.BlockSpec((1, 2 * C), lambda b, r: (0, 0)),      # fused b_kv
        ],
        out_specs=(pl.BlockSpec((1, tr, C), lambda b, r: (b, r, 0)),) * 2,
        compiler_params=cparams(("parallel", "parallel")),
    )(x, mean, inv_std, w_kv, b_kv)

    # ---- pass 3: inline-q flash attention + output projection + residual ----
    out = pl.pallas_call(
        flash_attn_proj_kernel,
        out_shape=jax.ShapeDtypeStruct((B, HW, C), x.dtype),
        grid=(B, nq, nk),
        in_specs=[
            pl.BlockSpec((1, tq, C), lambda b, qi, ki: (b, qi, 0)),   # x (residual + q src)
            pl.BlockSpec((1, 1, C), lambda b, qi, ki: (b, 0, 0)),     # mean
            pl.BlockSpec((1, 1, C), lambda b, qi, ki: (b, 0, 0)),     # inv_std
            pl.BlockSpec((C, C), lambda b, qi, ki: (0, 0)),           # W_q (folded, scaled)
            pl.BlockSpec((1, C), lambda b, qi, ki: (0, 0)),           # b_q (folded, scaled)
            pl.BlockSpec((1, tk, C), lambda b, qi, ki: (b, ki, 0)),   # k
            pl.BlockSpec((1, tk, C), lambda b, qi, ki: (b, ki, 0)),   # v
            pl.BlockSpec((C, C), lambda b, qi, ki: (0, 0)),           # W_proj
            pl.BlockSpec((1, C), lambda b, qi, ki: (0, 0)),           # b_proj
        ],
        out_specs=pl.BlockSpec((1, tq, C), lambda b, qi, ki: (b, qi, 0)),
        scratch_shapes=[pltpu.VMEM((tq, C), jnp.bfloat16),  # q tile (resident over ki)
                        pltpu.VMEM((tq, 1), jnp.float32),   # running max
                        pltpu.VMEM((tq, 1), jnp.float32),   # running sum
                        pltpu.VMEM((tq, C), jnp.float32)],  # accumulator
        # NOTE: x (operand 0) and the output share the SAME block_shape and
        # index_map; keep them identical or drop this alias.
        input_output_aliases={0: 0},
        compiler_params=cparams(("parallel", "parallel", "arbitrary")),
    )(x, mean, inv_std, w_q, b_q, k, v, wp_t, bp)

    # (B, HW, C) -> NCHW
    return jnp.transpose(out.reshape(B, H, W, C), (0, 3, 1, 2))


# ---------------------------------------------------------------------------
# pure-JAX reference (mirror of the PyTorch forward) and demo
# ---------------------------------------------------------------------------
def reference_forward(x_nchw, params, *, num_groups=32, eps=1e-6):
    B, C, H, W = x_nchw.shape
    G = num_groups
    xg = x_nchw.reshape(B, G, C // G, H, W)
    mean = xg.mean(axis=(2, 3, 4), keepdims=True)
    var = xg.var(axis=(2, 3, 4), keepdims=True)
    hn = ((xg - mean) / jnp.sqrt(var + eps)).reshape(B, C, H, W)
    hn = hn * params["gamma"][None, :, None, None] + params["beta"][None, :, None, None]

    def conv1x1(h, w, b):
        return jnp.einsum("bchw,oc->bohw", h, w) + b[None, :, None, None]

    q = conv1x1(hn, params["wq"], params["bq"])
    k = conv1x1(hn, params["wk"], params["bk"])
    v = conv1x1(hn, params["wv"], params["bv"])

    qf = q.reshape(B, C, H * W).transpose(0, 2, 1)
    kf = k.reshape(B, C, H * W)
    vf = v.reshape(B, C, H * W)
    w_ = jnp.einsum("bnc,bcm->bnm", qf, kf) * (float(C) ** -0.5)
    w_ = jax.nn.softmax(w_, axis=2)
    h_ = jnp.einsum("bcm,bnm->bcn", vf, w_).reshape(B, C, H, W)
    return x_nchw + conv1x1(h_, params["wp"], params["bp"])


def init_params(key, C):
    keys = jax.random.split(key, 10)
    s = 0.05
    return {
        "gamma": 1.0 + s * jax.random.normal(keys[0], (C,), jnp.float32),
        "beta": s * jax.random.normal(keys[1], (C,), jnp.float32),
        "wq": s * jax.random.normal(keys[2], (C, C), jnp.float32),
        "bq": s * jax.random.normal(keys[3], (C,), jnp.float32),
        "wk": s * jax.random.normal(keys[4], (C, C), jnp.float32),
        "bk": s * jax.random.normal(keys[5], (C,), jnp.float32),
        "wv": s * jax.random.normal(keys[6], (C, C), jnp.float32),
        "bv": s * jax.random.normal(keys[7], (C,), jnp.float32),
        "wp": s * jax.random.normal(keys[8], (C, C), jnp.float32),
        "bp": s * jax.random.normal(keys[9], (C,), jnp.float32),
    }


if __name__ == "__main__":
    # C=128 keeps the channel axis lane-dense (128 lanes) and GroupNorm(32, C) valid.
    B, C, H, W = 2, 128, 8, 8
    key = jax.random.PRNGKey(0)
    kx, kp = jax.random.split(key)
    x = jax.random.normal(kx, (B, C, H, W), jnp.float32)
    params = init_params(kp, C)

    fwd = jax.jit(attn_block_forward)
    out = jax.block_until_ready(fwd(x, params))

    ref = reference_forward(x, params)
    assert out.shape == (B, C, H, W)
    err = jnp.max(jnp.abs(out - ref))
    # bf16 MXU operands (f32 accumulation) -> relaxed tolerance vs f32 reference
    assert jnp.allclose(out, ref, atol=2e-2, rtol=2e-2), f"max err {err}"
    print("KERNEL_OK")
</pallas_src>

<mosaic_0001>
module attributes {stable_mosaic.version = 11 : i64} {
  func.func @groupnorm_sums_kernel(%arg0: i32, %arg1: i32, %arg2: memref<1x64x128xf32, #tpu.memory_space<vmem>>, %arg3: memref<1x1x128xf32, #tpu.memory_space<vmem>>, %arg4: memref<1x1x128xf32, #tpu.memory_space<vmem>>) attributes {dimension_semantics = [#tpu.dimension_semantics<parallel>, #tpu.dimension_semantics<arbitrary>], iteration_bounds = array<i64: 2, 1>, scalar_prefetch = 0 : i64, scratch_operands = 0 : i64, tpu.core_type = #tpu.core_type<tc>, window_params = [{transform_indices = @transform_0, window_bounds = array<i64: 1, 64, 128>}, {transform_indices = @transform_1, window_bounds = array<i64: 1, 1, 128>}, {transform_indices = @transform_2, window_bounds = array<i64: 1, 1, 128>}]} {
    %c0_i32 = arith.constant 0 : i32
    %0 = arith.cmpi eq, %arg1, %c0_i32 : i32
    %1 = arith.extui %0 : i1 to i32
    %c0_i32_0 = arith.constant 0 : i32
    %2 = arith.cmpi ne, %1, %c0_i32_0 : i32
    scf.if %2 {
      %cst_16 = arith.constant 0.000000e+00 : f32
      %22 = vector.broadcast %cst_16 : f32 to vector<1x1x128xf32>
      %c0_17 = arith.constant 0 : index
      %c0_18 = arith.constant 0 : index
      %c0_19 = arith.constant 0 : index
      %23 = vector.load %arg3[%c0_17, %c0_18, %c0_19] : memref<1x1x128xf32, #tpu.memory_space<vmem>>, vector<1x1x128xf32>
      tpu.vector_store %arg3[%c0_17, %c0_18, %c0_19], %22 {strides = array<i32>} : memref<1x1x128xf32, #tpu.memory_space<vmem>>, vector<1x1x128xf32>,
      %cst_20 = arith.constant 0.000000e+00 : f32
      %24 = vector.broadcast %cst_20 : f32 to vector<1x1x128xf32>
      %c0_21 = arith.constant 0 : index
      %c0_22 = arith.constant 0 : index
      %c0_23 = arith.constant 0 : index
      %25 = vector.load %arg4[%c0_21, %c0_22, %c0_23] : memref<1x1x128xf32, #tpu.memory_space<vmem>>, vector<1x1x128xf32>
      tpu.vector_store %arg4[%c0_21, %c0_22, %c0_23], %24 {strides = array<i32>} : memref<1x1x128xf32, #tpu.memory_space<vmem>>, vector<1x1x128xf32>,
    } else {
    }
    %c0 = arith.constant 0 : index
    %c0_1 = arith.constant 0 : index
    %c0_2 = arith.constant 0 : index
    %3 = vector.load %arg2[%c0, %c0_1, %c0_2] : memref<1x64x128xf32, #tpu.memory_space<vmem>>, vector<1x64x128xf32>
    %4 = vector.shape_cast %3 : vector<1x64x128xf32> to vector<64x128xf32>
    %c0_3 = arith.constant 0 : index
    %c0_4 = arith.constant 0 : index
    %c0_5 = arith.constant 0 : index
    %5 = vector.load %arg3[%c0_3, %c0_4, %c0_5] : memref<1x1x128xf32, #tpu.memory_space<vmem>>, vector<1x1x128xf32>
    %6 = vector.shape_cast %5 : vector<1x1x128xf32> to vector<1x128xf32>
    %cst = arith.constant dense<0.000000e+00> : vector<128xf32>
    %7 = vector.multi_reduction <add>, %4, %cst [0] : vector<64x128xf32> to vector<128xf32>
    %8 = vector.shape_cast %7 : vector<128xf32> to vector<1x128xf32>
    %9 = arith.addf %6, %8 : vector<1x128xf32>
    %c0_6 = arith.constant 0 : index
    %c0_7 = arith.constant 0 : index
    %c0_8 = arith.constant 0 : index
    %10 = vector.load %arg3[%c0_6, %c0_7, %c0_8] : memref<1x1x128xf32, #tpu.memory_space<vmem>>, vector<1x1x128xf32>
    %11 = vector.shape_cast %10 : vector<1x1x128xf32> to vector<1x128xf32>
    %12 = vector.shape_cast %9 : vector<1x128xf32> to vector<1x1x128xf32>
    tpu.vector_store %arg3[%c0_6, %c0_7, %c0_8], %12 {strides = array<i32>} : memref<1x1x128xf32, #tpu.memory_space<vmem>>, vector<1x1x128xf32>,
    %c0_9 = arith.constant 0 : index
    %c0_10 = arith.constant 0 : index
    %c0_11 = arith.constant 0 : index
    %13 = vector.load %arg4[%c0_9, %c0_10, %c0_11] : memref<1x1x128xf32, #tpu.memory_space<vmem>>, vector<1x1x128xf32>
    %14 = vector.shape_cast %13 : vector<1x1x128xf32> to vector<1x128xf32>
    %15 = arith.mulf %4, %4 : vector<64x128xf32>
    %cst_12 = arith.constant dense<0.000000e+00> : vector<128xf32>
    %16 = vector.multi_reduction <add>, %15, %cst_12 [0] : vector<64x128xf32> to vector<128xf32>
    %17 = vector.shape_cast %16 : vector<128xf32> to vector<1x128xf32>
    %18 = arith.addf %14, %17 : vector<1x128xf32>
    %c0_13 = arith.constant 0 : index
    %c0_14 = arith.constant 0 : index
    %c0_15 = arith.constant 0 : index
    %19 = vector.load %arg4[%c0_13, %c0_14, %c0_15] : memref<1x1x128xf32, #tpu.memory_space<vmem>>, vector<1x1x128xf32>
    %20 = vector.shape_cast %19 : vector<1x1x128xf32> to vector<1x128xf32>
    %21 = vector.shape_cast %18 : vector<1x128xf32> to vector<1x1x128xf32>
    tpu.vector_store %arg4[%c0_13, %c0_14, %c0_15], %21 {strides = array<i32>} : memref<1x1x128xf32, #tpu.memory_space<vmem>>, vector<1x1x128xf32>,
    return
  }
  func.func @transform_0(%arg0: i32, %arg1: i32) -> (i32, i32, i32) {
    %c0_i32 = arith.constant 0 : i32
    %c0_i32_0 = arith.constant 0 : i32
    return %arg0, %arg1, %c0_i32 : i32, i32, i32
  }
  func.func @transform_1(%arg0: i32, %arg1: i32) -> (i32, i32, i32) {
    %c0_i32 = arith.constant 0 : i32
    %c0_i32_0 = arith.constant 0 : i32
    %c0_i32_1 = arith.constant 0 : i32
    return %arg0, %c0_i32, %c0_i32_0 : i32, i32, i32
  }
  func.func @transform_2(%arg0: i32, %arg1: i32) -> (i32, i32, i32) {
    %c0_i32 = arith.constant 0 : i32
    %c0_i32_0 = arith.constant 0 : i32
    %c0_i32_1 = arith.constant 0 : i32
    return %arg0, %c0_i32, %c0_i32_0 : i32, i32, i32
  }
}

module attributes {stable_mosaic.version = 11 : i64} {
  func.func @norm_kv_kernel(%arg0: i32, %arg1: i32, %arg2: memref<1x64x128xf32, #tpu.memory_space<vmem>>, %arg3: memref<1x1x128xf32, #tpu.memory_space<vmem>>, %arg4: memref<1x1x128xf32, #tpu.memory_space<vmem>>, %arg5: memref<128x256xbf16, #tpu.memory_space<vmem>>, %arg6: memref<1x256xf32, #tpu.memory_space<vmem>>, %arg7: memref<1x64x128xbf16, #tpu.memory_space<vmem>>, %arg8: memref<1x64x128xbf16, #tpu.memory_space<vmem>>) attributes {dimension_semantics = [#tpu.dimension_semantics<parallel>, #tpu.dimension_semantics<parallel>], iteration_bounds = array<i64: 2, 1>, scalar_prefetch = 0 : i64, scratch_operands = 0 : i64, tpu.core_type = #tpu.core_type<tc>, window_params = [{transform_indices = @transform_0, window_bounds = array<i64: 1, 64, 128>}, {transform_indices = @transform_1, window_bounds = array<i64: 1, 1, 128>}, {transform_indices = @transform_2, window_bounds = array<i64: 1, 1, 128>}, {pipeline_mode = #tpu.pipeline_mode<synchronous>, transform_indices = @transform_3, window_bounds = array<i64: 128, 256>}, {pipeline_mode = #tpu.pipeline_mode<synchronous>, transform_indices = @transform_4, window_bounds = array<i64: 1, 256>}, {transform_indices = @transform_5, window_bounds = array<i64: 1, 64, 128>}, {transform_indices = @transform_6, window_bounds = array<i64: 1, 64, 128>}]} {
    %c0 = arith.constant 0 : index
    %c0_0 = arith.constant 0 : index
    %c0_1 = arith.constant 0 : index
    %0 = vector.load %arg2[%c0, %c0_0, %c0_1] : memref<1x64x128xf32, #tpu.memory_space<vmem>>, vector<1x64x128xf32>
    %1 = vector.shape_cast %0 : vector<1x64x128xf32> to vector<64x128xf32>
    %c0_2 = arith.constant 0 : index
    %c0_3 = arith.constant 0 : index
    %c0_4 = arith.constant 0 : index
    %2 = vector.load %arg3[%c0_2, %c0_3, %c0_4] : memref<1x1x128xf32, #tpu.memory_space<vmem>>, vector<1x1x128xf32>
    %3 = vector.shape_cast %2 : vector<1x1x128xf32> to vector<1x128xf32>
    %4 = vector.broadcast %3 : vector<1x128xf32> to vector<64x128xf32>
    %5 = arith.subf %1, %4 : vector<64x128xf32>
    %c0_5 = arith.constant 0 : index
    %c0_6 = arith.constant 0 : index
    %c0_7 = arith.constant 0 : index
    %6 = vector.load %arg4[%c0_5, %c0_6, %c0_7] : memref<1x1x128xf32, #tpu.memory_space<vmem>>, vector<1x1x128xf32>
    %7 = vector.shape_cast %6 : vector<1x1x128xf32> to vector<1x128xf32>
    %8 = vector.broadcast %7 : vector<1x128xf32> to vector<64x128xf32>
    %9 = arith.mulf %5, %8 : vector<64x128xf32>
    %10 = arith.truncf %9 : vector<64x128xf32> to vector<64x128xbf16>
    %c0_8 = arith.constant 0 : index
    %c0_9 = arith.constant 0 : index
    %11 = vector.load %arg5[%c0_8, %c0_9] : memref<128x256xbf16, #tpu.memory_space<vmem>>, vector<128x256xbf16>
    %cst = arith.constant dense<0.000000e+00> : vector<64x256xf32>
    %12 = tpu.matmul %10, %11, %cst {dimension_numbers = #tpu.dot_dimension_numbers<[1], [0], [0], [1], [0, 0, 1, 1], [], []>} : vector<64x128xbf16>, vector<128x256xbf16>, vector<64x256xf32> -> vector<64x256xf32>
    %c0_10 = arith.constant 0 : index
    %c0_11 = arith.constant 0 : index
    %13 = vector.load %arg6[%c0_10, %c0_11] : memref<1x256xf32, #tpu.memory_space<vmem>>, vector<1x256xf32>
    %14 = vector.broadcast %13 : vector<1x256xf32> to vector<64x256xf32>
    %15 = arith.addf %12, %14 : vector<64x256xf32>
    %16 = vector.extract_strided_slice %15 {offsets = [0, 0], sizes = [64, 128], strides = [1, 1]} : vector<64x256xf32> to vector<64x128xf32>
    %17 = arith.truncf %16 : vector<64x128xf32> to vector<64x128xbf16>
    %c0_12 = arith.constant 0 : index
    %c0_13 = arith.constant 0 : index
    %c0_14 = arith.constant 0 : index
    %18 = vector.load %arg7[%c0_12, %c0_13, %c0_14] : memref<1x64x128xbf16, #tpu.memory_space<vmem>>, vector<1x64x128xbf16>
    %19 = vector.shape_cast %18 : vector<1x64x128xbf16> to vector<64x128xbf16>
    %20 = vector.shape_cast %17 : vector<64x128xbf16> to vector<1x64x128xbf16>
    tpu.vector_store %arg7[%c0_12, %c0_13, %c0_14], %20 {strides = array<i32>} : memref<1x64x128xbf16, #tpu.memory_space<vmem>>, vector<1x64x128xbf16>,
    %21 = vector.extract_strided_slice %15 {offsets = [0, 128], sizes = [64, 128], strides = [1, 1]} : vector<64x256xf32> to vector<64x128xf32>
    %22 = arith.truncf %21 : vector<64x128xf32> to vector<64x128xbf16>
    %c0_15 = arith.constant 0 : index
    %c0_16 = arith.constant 0 : index
    %c0_17 = arith.constant 0 : index
    %23 = vector.load %arg8[%c0_15, %c0_16, %c0_17] : memref<1x64x128xbf16, #tpu.memory_space<vmem>>, vector<1x64x128xbf16>
    %24 = vector.shape_cast %23 : vector<1x64x128xbf16> to vector<64x128xbf16>
    %25 = vector.shape_cast %22 : vector<64x128xbf16> to vector<1x64x128xbf16>
    tpu.vector_store %arg8[%c0_15, %c0_16, %c0_17], %25 {strides = array<i32>} : memref<1x64x128xbf16, #tpu.memory_space<vmem>>, vector<1x64x128xbf16>,
    return
  }
  func.func @transform_0(%arg0: i32, %arg1: i32) -> (i32, i32, i32) {
    %c0_i32 = arith.constant 0 : i32
    %c0_i32_0 = arith.constant 0 : i32
    return %arg0, %arg1, %c0_i32 : i32, i32, i32
  }
  func.func @transform_1(%arg0: i32, %arg1: i32) -> (i32, i32, i32) {
    %c0_i32 = arith.constant 0 : i32
    %c0_i32_0 = arith.constant 0 : i32
    %c0_i32_1 = arith.constant 0 : i32
    return %arg0, %c0_i32, %c0_i32_0 : i32, i32, i32
  }
  func.func @transform_2(%arg0: i32, %arg1: i32) -> (i32, i32, i32) {
    %c0_i32 = arith.constant 0 : i32
    %c0_i32_0 = arith.constant 0 : i32
    %c0_i32_1 = arith.constant 0 : i32
    return %arg0, %c0_i32, %c0_i32_0 : i32, i32, i32
  }
  func.func @transform_3(%arg0: i32, %arg1: i32) -> (i32, i32) {
    %c0_i32 = arith.constant 0 : i32
    %c0_i32_0 = arith.constant 0 : i32
    %c0_i32_1 = arith.constant 0 : i32
    return %c0_i32, %c0_i32_0 : i32, i32
  }
  func.func @transform_4(%arg0: i32, %arg1: i32) -> (i32, i32) {
    %c0_i32 = arith.constant 0 : i32
    %c0_i32_0 = arith.constant 0 : i32
    %c0_i32_1 = arith.constant 0 : i32
    return %c0_i32, %c0_i32_0 : i32, i32
  }
  func.func @transform_5(%arg0: i32, %arg1: i32) -> (i32, i32, i32) {
    %c0_i32 = arith.constant 0 : i32
    %c0_i32_0 = arith.constant 0 : i32
    return %arg0, %arg1, %c0_i32 : i32, i32, i32
  }
  func.func @transform_6(%arg0: i32, %arg1: i32) -> (i32, i32, i32) {
    %c0_i32 = arith.constant 0 : i32
    %c0_i32_0 = arith.constant 0 : i32
    return %arg0, %arg1, %c0_i32 : i32, i32, i32
  }
}

module attributes {stable_mosaic.version = 11 : i64} {
  func.func @flash_attn_proj_kernel(%arg0: i32, %arg1: i32, %arg2: i32, %arg3: memref<1x64x128xf32, #tpu.memory_space<vmem>>, %arg4: memref<1x1x128xf32, #tpu.memory_space<vmem>>, %arg5: memref<1x1x128xf32, #tpu.memory_space<vmem>>, %arg6: memref<128x128xbf16, #tpu.memory_space<vmem>>, %arg7: memref<1x128xf32, #tpu.memory_space<vmem>>, %arg8: memref<1x64x128xbf16, #tpu.memory_space<vmem>>, %arg9: memref<1x64x128xbf16, #tpu.memory_space<vmem>>, %arg10: memref<128x128xbf16, #tpu.memory_space<vmem>>, %arg11: memref<1x128xf32, #tpu.memory_space<vmem>>, %arg12: memref<1x64x128xf32, #tpu.memory_space<vmem>>, %arg13: memref<64x128xbf16, #tpu.memory_space<vmem>>, %arg14: memref<64x1xf32, #tpu.memory_space<vmem>>, %arg15: memref<64x1xf32, #tpu.memory_space<vmem>>, %arg16: memref<64x128xf32, #tpu.memory_space<vmem>>) attributes {dimension_semantics = [#tpu.dimension_semantics<parallel>, #tpu.dimension_semantics<parallel>, #tpu.dimension_semantics<arbitrary>], iteration_bounds = array<i64: 2, 1, 1>, scalar_prefetch = 0 : i64, scratch_operands = 4 : i64, tpu.core_type = #tpu.core_type<tc>, window_params = [{transform_indices = @transform_0, window_bounds = array<i64: 1, 64, 128>}, {transform_indices = @transform_1, window_bounds = array<i64: 1, 1, 128>}, {transform_indices = @transform_2, window_bounds = array<i64: 1, 1, 128>}, {pipeline_mode = #tpu.pipeline_mode<synchronous>, transform_indices = @transform_3, window_bounds = array<i64: 128, 128>}, {pipeline_mode = #tpu.pipeline_mode<synchronous>, transform_indices = @transform_4, window_bounds = array<i64: 1, 128>}, {transform_indices = @transform_5, window_bounds = array<i64: 1, 64, 128>}, {transform_indices = @transform_6, window_bounds = array<i64: 1, 64, 128>}, {pipeline_mode = #tpu.pipeline_mode<synchronous>, transform_indices = @transform_7, window_bounds = array<i64: 128, 128>}, {pipeline_mode = #tpu.pipeline_mode<synchronous>, transform_indices = @transform_8, window_bounds = array<i64: 1, 128>}, {transform_indices = @transform_9, window_bounds = array<i64: 1, 64, 128>}]} {
    %c0_i32 = arith.constant 0 : i32
    %0 = arith.cmpi eq, %arg2, %c0_i32 : i32
    %1 = arith.extui %0 : i1 to i32
    %c0_i32_0 = arith.constant 0 : i32
    %2 = arith.cmpi ne, %1, %c0_i32_0 : i32
    scf.if %2 {
      %c0_25 = arith.constant 0 : index
      %c0_26 = arith.constant 0 : index
      %c0_27 = arith.constant 0 : index
      %35 = vector.load %arg3[%c0_25, %c0_26, %c0_27] : memref<1x64x128xf32, #tpu.memory_space<vmem>>, vector<1x64x128xf32>
      %36 = vector.shape_cast %35 : vector<1x64x128xf32> to vector<64x128xf32>
      %c0_28 = arith.constant 0 : index
      %c0_29 = arith.constant 0 : index
      %c0_30 = arith.constant 0 : index
      %37 = vector.load %arg4[%c0_28, %c0_29, %c0_30] : memref<1x1x128xf32, #tpu.memory_space<vmem>>, vector<1x1x128xf32>
      %38 = vector.shape_cast %37 : vector<1x1x128xf32> to vector<1x128xf32>
      %39 = vector.broadcast %38 : vector<1x128xf32> to vector<64x128xf32>
      %40 = arith.subf %36, %39 : vector<64x128xf32>
      %c0_31 = arith.constant 0 : index
      %c0_32 = arith.constant 0 : index
      %c0_33 = arith.constant 0 : index
      %41 = vector.load %arg5[%c0_31, %c0_32, %c0_33] : memref<1x1x128xf32, #tpu.memory_space<vmem>>, vector<1x1x128xf32>
      %42 = vector.shape_cast %41 : vector<1x1x128xf32> to vector<1x128xf32>
      %43 = vector.broadcast %42 : vector<1x128xf32> to vector<64x128xf32>
      %44 = arith.mulf %40, %43 : vector<64x128xf32>
      %45 = arith.truncf %44 : vector<64x128xf32> to vector<64x128xbf16>
      %c0_34 = arith.constant 0 : index
      %c0_35 = arith.constant 0 : index
      %46 = vector.load %arg6[%c0_34, %c0_35] : memref<128x128xbf16, #tpu.memory_space<vmem>>, vector<128x128xbf16>
      %cst_36 = arith.constant dense<0.000000e+00> : vector<64x128xf32>
      %47 = tpu.matmul %45, %46, %cst_36 {dimension_numbers = #tpu.dot_dimension_numbers<[1], [0], [0], [1], [0, 0, 1, 1], [], []>} : vector<64x128xbf16>, vector<128x128xbf16>, vector<64x128xf32> -> vector<64x128xf32>
      %c0_37 = arith.constant 0 : index
      %c0_38 = arith.constant 0 : index
      %48 = vector.load %arg7[%c0_37, %c0_38] : memref<1x128xf32, #tpu.memory_space<vmem>>, vector<1x128xf32>
      %49 = vector.broadcast %48 : vector<1x128xf32> to vector<64x128xf32>
      %50 = arith.addf %47, %49 : vector<64x128xf32>
      %51 = arith.truncf %50 : vector<64x128xf32> to vector<64x128xbf16>
      %c0_39 = arith.constant 0 : index
      %c0_40 = arith.constant 0 : index
      %52 = vector.load %arg13[%c0_39, %c0_40] : memref<64x128xbf16, #tpu.memory_space<vmem>>, vector<64x128xbf16>
      tpu.vector_store %arg13[%c0_39, %c0_40], %51 {strides = array<i32>} : memref<64x128xbf16, #tpu.memory_space<vmem>>, vector<64x128xbf16>,
      %cst_41 = arith.constant 0xFF800000 : f32
      %53 = vector.broadcast %cst_41 : f32 to vector<64x1xf32>
      %c0_42 = arith.constant 0 : index
      %c0_43 = arith.constant 0 : index
      %54 = vector.load %arg14[%c0_42, %c0_43] : memref<64x1xf32, #tpu.memory_space<vmem>>, vector<64x1xf32>
      tpu.vector_store %arg14[%c0_42, %c0_43], %53 {strides = array<i32>} : memref<64x1xf32, #tpu.memory_space<vmem>>, vector<64x1xf32>,
      %cst_44 = arith.constant 0.000000e+00 : f32
      %55 = vector.broadcast %cst_44 : f32 to vector<64x1xf32>
      %c0_45 = arith.constant 0 : index
      %c0_46 = arith.constant 0 : index
      %56 = vector.load %arg15[%c0_45, %c0_46] : memref<64x1xf32, #tpu.memory_space<vmem>>, vector<64x1xf32>
      tpu.vector_store %arg15[%c0_45, %c0_46], %55 {strides = array<i32>} : memref<64x1xf32, #tpu.memory_space<vmem>>, vector<64x1xf32>,
      %cst_47 = arith.constant 0.000000e+00 : f32
      %57 = vector.broadcast %cst_47 : f32 to vector<64x128xf32>
      %c0_48 = arith.constant 0 : index
      %c0_49 = arith.constant 0 : index
      %58 = vector.load %arg16[%c0_48, %c0_49] : memref<64x128xf32, #tpu.memory_space<vmem>>, vector<64x128xf32>
      tpu.vector_store %arg16[%c0_48, %c0_49], %57 {strides = array<i32>} : memref<64x128xf32, #tpu.memory_space<vmem>>, vector<64x128xf32>,
    } else {
    }
    %c0 = arith.constant 0 : index
    %c0_1 = arith.constant 0 : index
    %3 = vector.load %arg13[%c0, %c0_1] : memref<64x128xbf16, #tpu.memory_space<vmem>>, vector<64x128xbf16>
    %c0_2 = arith.constant 0 : index
    %c0_3 = arith.constant 0 : index
    %c0_4 = arith.constant 0 : index
    %4 = vector.load %arg8[%c0_2, %c0_3, %c0_4] : memref<1x64x128xbf16, #tpu.memory_space<vmem>>, vector<1x64x128xbf16>
    %5 = vector.shape_cast %4 : vector<1x64x128xbf16> to vector<64x128xbf16>
    %cst = arith.constant dense<0.000000e+00> : vector<64x64xf32>
    %6 = tpu.matmul %3, %5, %cst {dimension_numbers = #tpu.dot_dimension_numbers<[1], [1], [0], [0], [0, 0, 1, 0], [], []>} : vector<64x128xbf16>, vector<64x128xbf16>, vector<64x64xf32> -> vector<64x64xf32>
    %c0_5 = arith.constant 0 : index
    %c0_6 = arith.constant 0 : index
    %7 = vector.load %arg14[%c0_5, %c0_6] : memref<64x1xf32, #tpu.memory_space<vmem>>, vector<64x1xf32>
    %cst_7 = arith.constant dense<0xFF800000> : vector<64xf32>
    %8 = vector.multi_reduction <maximumf>, %6, %cst_7 [1] : vector<64x64xf32> to vector<64xf32>
    %9 = vector.shape_cast %8 : vector<64xf32> to vector<64x1xf32>
    %10 = arith.maximumf %7, %9 : vector<64x1xf32>
    %11 = arith.subf %7, %10 : vector<64x1xf32>
    %12 = math.exp %11 : vector<64x1xf32>
    %13 = vector.broadcast %10 : vector<64x1xf32> to vector<64x64xf32>
    %14 = arith.subf %6, %13 : vector<64x64xf32>
    %15 = math.exp %14 : vector<64x64xf32>
    %c0_8 = arith.constant 0 : index
    %c0_9 = arith.constant 0 : index
    %16 = vector.load %arg15[%c0_8, %c0_9] : memref<64x1xf32, #tpu.memory_space<vmem>>, vector<64x1xf32>
    %17 = arith.mulf %12, %16 : vector<64x1xf32>
    %cst_10 = arith.constant dense<0.000000e+00> : vector<64xf32>
    %18 = vector.multi_reduction <add>, %15, %cst_10 [1] : vector<64x64xf32> to vector<64xf32>
    %19 = vector.shape_cast %18 : vector<64xf32> to vector<64x1xf32>
    %20 = arith.addf %17, %19 : vector<64x1xf32>
    %c0_11 = arith.constant 0 : index
    %c0_12 = arith.constant 0 : index
    %21 = vector.load %arg15[%c0_11, %c0_12] : memref<64x1xf32, #tpu.memory_space<vmem>>, vector<64x1xf32>
    tpu.vector_store %arg15[%c0_11, %c0_12], %20 {strides = array<i32>} : memref<64x1xf32, #tpu.memory_space<vmem>>, vector<64x1xf32>,
    %c0_13 = arith.constant 0 : index
    %c0_14 = arith.constant 0 : index
    %22 = vector.load %arg16[%c0_13, %c0_14] : memref<64x128xf32, #tpu.memory_space<vmem>>, vector<64x128xf32>
    %23 = vector.broadcast %12 : vector<64x1xf32> to vector<64x128xf32>
    %24 = arith.mulf %23, %22 : vector<64x128xf32>
    %25 = arith.truncf %15 : vector<64x64xf32> to vector<64x64xbf16>
    %c0_15 = arith.constant 0 : index
    %c0_16 = arith.constant 0 : index
    %c0_17 = arith.constant 0 : index
    %26 = vector.load %arg9[%c0_15, %c0_16, %c0_17] : memref<1x64x128xbf16, #tpu.memory_space<vmem>>, vector<1x64x128xbf16>
    %27 = vector.shape_cast %26 : vector<1x64x128xbf16> to vector<64x128xbf16>
    %cst_18 = arith.constant dense<0.000000e+00> : vector<64x128xf32>
    %28 = tpu.matmul %25, %27, %cst_18 {dimension_numbers = #tpu.dot_dimension_numbers<[1], [0], [0], [1], [0, 0, 1, 1], [], []>} : vector<64x64xbf16>, vector<64x128xbf16>, vector<64x128xf32> -> vector<64x128xf32>
    %29 = arith.addf %24, %28 : vector<64x128xf32>
    %c0_19 = arith.constant 0 : index
    %c0_20 = arith.constant 0 : index
    %30 = vector.load %arg16[%c0_19, %c0_20] : memref<64x128xf32, #tpu.memory_space<vmem>>, vector<64x128xf32>
    tpu.vector_store %arg16[%c0_19, %c0_20], %29 {strides = array<i32>} : memref<64x128xf32, #tpu.memory_space<vmem>>, vector<64x128xf32>,
    %c0_21 = arith.constant 0 : index
    %c0_22 = arith.constant 0 : index
    %31 = vector.load %arg14[%c0_21, %c0_22] : memref<64x1xf32, #tpu.memory_space<vmem>>, vector<64x1xf32>
    tpu.vector_store %arg14[%c0_21, %c0_22], %10 {strides = array<i32>} : memref<64x1xf32, #tpu.memory_space<vmem>>, vector<64x1xf32>,
    %c0_i32_23 = arith.constant 0 : i32
    %32 = arith.cmpi eq, %arg2, %c0_i32_23 : i32
    %33 = arith.extui %32 : i1 to i32
    %c0_i32_24 = arith.constant 0 : i32
    %34 = arith.cmpi ne, %33, %c0_i32_24 : i32
    scf.if %34 {
      %c0_25 = arith.constant 0 : index
      %c0_26 = arith.constant 0 : index
      %35 = vector.load %arg16[%c0_25, %c0_26] : memref<64x128xf32, #tpu.memory_space<vmem>>, vector<64x128xf32>
      %c0_27 = arith.constant 0 : index
      %c0_28 = arith.constant 0 : index
      %36 = vector.load %arg15[%c0_27, %c0_28] : memref<64x1xf32, #tpu.memory_space<vmem>>, vector<64x1xf32>
      %37 = tpu.reciprocal %36 {approx = true} : vector<64x1xf32> -> vector<64x1xf32>
      %38 = vector.broadcast %37 : vector<64x1xf32> to vector<64x128xf32>
      %39 = arith.mulf %35, %38 : vector<64x128xf32>
      %40 = arith.truncf %39 : vector<64x128xf32> to vector<64x128xbf16>
      %c0_29 = arith.constant 0 : index
      %c0_30 = arith.constant 0 : index
      %41 = vector.load %arg10[%c0_29, %c0_30] : memref<128x128xbf16, #tpu.memory_space<vmem>>, vector<128x128xbf16>
      %cst_31 = arith.constant dense<0.000000e+00> : vector<64x128xf32>
      %42 = tpu.matmul %40, %41, %cst_31 {dimension_numbers = #tpu.dot_dimension_numbers<[1], [0], [0], [1], [0, 0, 1, 1], [], []>} : vector<64x128xbf16>, vector<128x128xbf16>, vector<64x128xf32> -> vector<64x128xf32>
      %c0_32 = arith.constant 0 : index
      %c0_33 = arith.constant 0 : index
      %43 = vector.load %arg11[%c0_32, %c0_33] : memref<1x128xf32, #tpu.memory_space<vmem>>, vector<1x128xf32>
      %44 = vector.broadcast %43 : vector<1x128xf32> to vector<64x128xf32>
      %45 = arith.addf %42, %44 : vector<64x128xf32>
      %c0_34 = arith.constant 0 : index
      %c0_35 = arith.constant 0 : index
      %c0_36 = arith.constant 0 : index
      %46 = vector.load %arg3[%c0_34, %c0_35, %c0_36] : memref<1x64x128xf32, #tpu.memory_space<vmem>>, vector<1x64x128xf32>
      %47 = vector.shape_cast %46 : vector<1x64x128xf32> to vector<64x128xf32>
      %48 = arith.addf %47, %45 : vector<64x128xf32>
      %c0_37 = arith.constant 0 : index
      %c0_38 = arith.constant 0 : index
      %c0_39 = arith.constant 0 : index
      %49 = vector.load %arg12[%c0_37, %c0_38, %c0_39] : memref<1x64x128xf32, #tpu.memory_space<vmem>>, vector<1x64x128xf32>
      %50 = vector.shape_cast %49 : vector<1x64x128xf32> to vector<64x128xf32>
      %51 = vector.shape_cast %48 : vector<64x128xf32> to vector<1x64x128xf32>
      tpu.vector_store %arg12[%c0_37, %c0_38, %c0_39], %51 {strides = array<i32>} : memref<1x64x128xf32, #tpu.memory_space<vmem>>, vector<1x64x128xf32>,
    } else {
    }
    return
  }
  func.func @transform_0(%arg0: i32, %arg1: i32, %arg2: i32) -> (i32, i32, i32) {
    %c0_i32 = arith.constant 0 : i32
    %c0_i32_0 = arith.constant 0 : i32
    return %arg0, %arg1, %c0_i32 : i32, i32, i32
  }
  func.func @transform_1(%arg0: i32, %arg1: i32, %arg2: i32) -> (i32, i32, i32) {
    %c0_i32 = arith.constant 0 : i32
    %c0_i32_0 = arith.constant 0 : i32
    %c0_i32_1 = arith.constant 0 : i32
    return %arg0, %c0_i32, %c0_i32_0 : i32, i32, i32
  }
  func.func @transform_2(%arg0: i32, %arg1: i32, %arg2: i32) -> (i32, i32, i32) {
    %c0_i32 = arith.constant 0 : i32
    %c0_i32_0 = arith.constant 0 : i32
    %c0_i32_1 = arith.constant 0 : i32
    return %arg0, %c0_i32, %c0_i32_0 : i32, i32, i32
  }
  func.func @transform_3(%arg0: i32, %arg1: i32, %arg2: i32) -> (i32, i32) {
    %c0_i32 = arith.constant 0 : i32
    %c0_i32_0 = arith.constant 0 : i32
    %c0_i32_1 = arith.constant 0 : i32
    return %c0_i32, %c0_i32_0 : i32, i32
  }
  func.func @transform_4(%arg0: i32, %arg1: i32, %arg2: i32) -> (i32, i32) {
    %c0_i32 = arith.constant 0 : i32
    %c0_i32_0 = arith.constant 0 : i32
    %c0_i32_1 = arith.constant 0 : i32
    return %c0_i32, %c0_i32_0 : i32, i32
  }
  func.func @transform_5(%arg0: i32, %arg1: i32, %arg2: i32) -> (i32, i32, i32) {
    %c0_i32 = arith.constant 0 : i32
    %c0_i32_0 = arith.constant 0 : i32
    return %arg0, %arg2, %c0_i32 : i32, i32, i32
  }
  func.func @transform_6(%arg0: i32, %arg1: i32, %arg2: i32) -> (i32, i32, i32) {
    %c0_i32 = arith.constant 0 : i32
    %c0_i32_0 = arith.constant 0 : i32
    return %arg0, %arg2, %c0_i32 : i32, i32, i32
  }
  func.func @transform_7(%arg0: i32, %arg1: i32, %arg2: i32) -> (i32, i32) {
    %c0_i32 = arith.constant 0 : i32
    %c0_i32_0 = arith.constant 0 : i32
    %c0_i32_1 = arith.constant 0 : i32
    return %c0_i32, %c0_i32_0 : i32, i32
  }
  func.func @transform_8(%arg0: i32, %arg1: i32, %arg2: i32) -> (i32, i32) {
    %c0_i32 = arith.constant 0 : i32
    %c0_i32_0 = arith.constant 0 : i32
    %c0_i32_1 = arith.constant 0 : i32
    return %c0_i32, %c0_i32_0 : i32, i32
  }
  func.func @transform_9(%arg0: i32, %arg1: i32, %arg2: i32) -> (i32, i32, i32) {
    %c0_i32 = arith.constant 0 : i32
    %c0_i32_0 = arith.constant 0 : i32
    return %arg0, %arg1, %c0_i32 : i32, i32, i32
  }
}

</mosaic_0001>

<bundles_post_ra>
// kernel: attn_block_forward.3
= control target key start
LH: loop header
LB: loop body
LE: loop exit
PB: predicated region body
PF: predicated region fallthrough
CT: control target
= control target key end

     0   :  { %s392_s9 = smov 0   ;;  %s394_s10 = smov 0   ;;  %s438_s0 = inlined_call_operand.vmem [shape: f32[2,64,128], index: 0, kind: input, shape index: {}]   ;;  %s439_s1 = inlined_call_operand.vmem [shape: f32[2,1,128], index: 1, kind: output, shape index: {0}]   ;;  %s440_s2 = inlined_call_operand.vmem [shape: f32[2,1,128], index: 2, kind: output, shape index: {1}]  }
   0x1   :  { %s396_s11 = smov 0  }
   0x2 LB: > { %s25_s12 = sadd.s32 1, %s370_s10  ;;  %p321_p0 = scmp.ge.s32.totalorder %s374_s11, 1  ;;  %s374_s11 = sphi %s396_s11, %s13_s11   ;;  %s370_s10 = sphi %s394_s10, %s442_s10   ;;  %s366_s9 = sphi %s392_s9, %s441_s9  }
   0x3   : > { %p27_p1 = scmp.ge.s32.totalorder %s25_s12, 2  ;;  %p134_p2 = scmp.lt.s32.totalorder %s374_s11, 3 }
   0x5   : > { %s444_s12 = smov (%p27_p1, %s25_s12), 0  ;;  %p135_p3 = pnand %p321_p0, %p134_p2 }
   0x6   : > { %p162_p4 = scmp.lt.s32.totalorder (!%p135_p3), %s366_s9, 1  ;;  %v376_v0 = vmov (!%p135_p3), 0.0  }
   0x7   : > { %138 = sbr.rel (%p135_p3) target bundleno = 49 (0x31), region = 24 }
   0xe   : > { %s446_s9 = smov (!%p162_p4, %s366_s9), 1 }
   0xf   : > { %s326_s13 = sshll.u32 %s446_s9, 6  ;;  %s413_s16 = scalar_lea.vmem %s439_s1, %s446_s9 }
  0x10   : > { %s169_s19 = scalar_lea.vmem %s438_s0, %s326_s13  ;;  %181 = vst [vmem:[%s413_s16] sm:$0x1] %v376_v0  ;;  %s422_s22 = scalar_lea.vmem %s440_s2, %s446_s9 }
  0x11   : > { %182 = vst [vmem:[%s422_s22] sm:$0x1] %v376_v0  ;;  %v183_v1 = vld [vmem:[%s169_s19] sm:$0xff]  ;;  %v184_v2 = vld [vmem:[%s169_s19 + $0x8] sm:$0xff]  ;;  %v185_v3 = vld [vmem:[%s169_s19 + $0x10] sm:$0xff] }
  0x12   : > { %v186_v4 = vld [vmem:[%s169_s19 + $0x18] sm:$0xff]  ;;  %v192_v5 = vadd.f32 %v184_v2, %v183_v1  ;;  %v208_v6 = vmul.f32 %v183_v1, %v183_v1  ;;  %v209_v7 = vmul.f32 %v184_v2, %v184_v2  ;;  %v210_v8 = vmul.f32 %v185_v3, %v185_v3  ;;  %v187_v9 = vld [vmem:[%s169_s19 + $0x20] sm:$0xff]  ;;  %v188_v13 = vld [vmem:[%s169_s19 + $0x28] sm:$0xff] }
  0x13   : > { %v211_v11 = vmul.f32 %v186_v4, %v186_v4  ;;  %v212_v15 = vmul.f32 %v187_v9, %v187_v9  ;;  %v189_v17 = vld [vmem:[%s169_s19 + $0x30] sm:$0xff]  ;;  %v213_v19 = vmul.f32 %v188_v13, %v188_v13  ;;  %v190_v21 = vld [vmem:[%s169_s19 + $0x38] sm:$0xff] }
  0x14   : > { %v193_v10 = vadd.f32 %v192_v5, %v185_v3  ;;  %v216_v12 = vadd.f32 %v209_v7, %v208_v6  ;;  %v214_v23 = vmul.f32 %v189_v17, %v189_v17  ;;  %v215_v26 = vmul.f32 %v190_v21, %v190_v21 }
  0x16   : > { %v194_v14 = vadd.f32 %v193_v10, %v186_v4  ;;  %v217_v16 = vadd.f32 %v216_v12, %v210_v8 }
  0x17   : > { %v191_v40 = vld [vmem:[%s413_s16] sm:$0x1] }
  0x18   : > { %v195_v18 = vadd.f32 %v194_v14, %v187_v9  ;;  %v218_v20 = vadd.f32 %v217_v16, %v211_v11  ;;  %v207_v43 = vld [vmem:[%s422_s22] sm:$0x1] }
  0x1a   : > { %v196_v22 = vadd.f32 %v195_v18, %v188_v13  ;;  %v219_v24 = vadd.f32 %v218_v20, %v212_v15 }
  0x1c   : > { %v197_v25 = vadd.f32 %v196_v22, %v189_v17  ;;  %v220_v27 = vadd.f32 %v219_v24, %v213_v19 }
  0x1e   : > { %v198_v28 = vadd.f32 %v197_v25, %v190_v21  ;;  %v221_v29 = vadd.f32 %v220_v27, %v214_v23 }
  0x20   : > { %v199_v30 = vrot.slane %v198_v28, 4  ;;  %v222_v31 = vadd.f32 %v221_v29, %v215_v26 }
  0x22   : > { %v200_v32 = vadd.f32 %v199_v30, %v198_v28  ;;  %v223_v33 = vrot.slane %v222_v31, 4 }
  0x24   : > { %v201_v34 = vrot.slane %v200_v32, 2  ;;  %v224_v35 = vadd.f32 %v223_v33, %v222_v31 }
  0x26   : > { %v202_v36 = vadd.f32 %v201_v34, %v200_v32  ;;  %v225_v37 = vrot.slane %v224_v35, 2 }
  0x28   : > { %v203_v38 = vrot.slane %v202_v36, 1  ;;  %v226_v39 = vadd.f32 %v225_v37, %v224_v35 }
  0x2a   : > { %v204_v41 = vadd.f32 %v203_v38, %v202_v36  ;;  %v227_v42 = vrot.slane %v226_v39, 1 }
  0x2c   : > { %v205_v44 = vadd.f32 %v204_v41, %v191_v40  ;;  %v228_v45 = vadd.f32 %v227_v42, %v226_v39 }
  0x2e   : > { %206 = vst [vmem:[%s413_s16] sm:$0x1] %v205_v44  ;;  %v229_v46 = vadd.f32 %v228_v45, %v207_v43 }
  0x30   : > { %230 = vst [vmem:[%s422_s22] sm:$0x1] %v229_v46 }
  0x31 PF: > { %s13_s11 = sadd.s32 1, %s374_s11   ;;  %s441_s9 = smov %s370_s10 }
  0x32   : > { %p10_p5 = scmp.ge.s32.totalorder %s13_s11, 4   ;;  %s442_s10 = smov %s444_s12 }
  0x34   :  { %12 = sbr.rel (!%p10_p5) target bundleno = 2 (0x2), region = 70 }

// kernel: attn_block_forward.4
= control target key start
LH: loop header
LB: loop body
LE: loop exit
PB: predicated region body
PF: predicated region fallthrough
CT: control target
= control target key end

     0   :  { %s1039_s21 = smov 0   ;;  %s1041_s22 = smov 0   ;;  %s1162_s0 = inlined_call_operand.vmem [shape: f32[2,64,128], index: 0, kind: input, shape index: {}]   ;;  %s1163_s1 = inlined_call_operand.vmem [shape: f32[2,1,128], index: 1, kind: input, shape index: {}]   ;;  %s1164_s2 = inlined_call_operand.vmem [shape: f32[2,1,128], index: 2, kind: input, shape index: {}]   ;;  %s1165_s3 = inlined_call_operand.vmem [shape: bf16[128,256], index: 3, kind: input, shape index: {}]   ;;  %s1166_s4 = inlined_call_operand.vmem [shape: f32[1,256], index: 4, kind: input, shape index: {}]   ;;  %s1167_s5 = inlined_call_operand.vmem [shape: bf16[2,64,128], index: 5, kind: output, shape index: {0}]   ;;  %s1168_s6 = inlined_call_operand.vmem [shape: bf16[2,64,128], index: 6, kind: output, shape index: {1}]  }
   0x1   :  { %s1043_s23 = smov 0  }
   0x2 LB: > { %s29_s24 = sadd.s32 1, %s997_s22  ;;  %p806_p0 = scmp.ge.s32.totalorder %s1001_s23, 1  ;;  %s1001_s23 = sphi %s1043_s23, %s17_s23   ;;  %s997_s22 = sphi %s1041_s22, %s1170_s22   ;;  %s993_s21 = sphi %s1039_s21, %s1169_s21  }
   0x3   : > { %p31_p1 = scmp.ge.s32.totalorder %s29_s24, 2  ;;  %p254_p2 = scmp.lt.s32.totalorder %s1001_s23, 3 }
   0x5   : > { %s1172_s24 = smov (%p31_p1, %s29_s24), 0  ;;  %p255_p3 = pnand %p806_p0, %p254_p2 }
   0x6   : > { %v955_v0 = vld [vmem:[%s1165_s3 + $0x4] ss:$8 sps:$4 sm:$0xff] (!%p255_p3)   ;;  %v957_v1 = vld [vmem:[%s1165_s3] ss:$8 sps:$4 sm:$0xff] (!%p255_p3)   ;;  %v1003_v2 = vmov (!%p255_p3), 0   ;;  %p308_p4 = scmp.lt.s32.totalorder (!%p255_p3), %s993_s21, 1  ;;  %v404_v47 = vlaneseq (!%p255_p3) }
   0x7   : > { %258 = sbr.rel (%p255_p3) target bundleno = 268 (0x10c), region = 40  ;;  %526 = vmatprep.mubr.bf16.mxu0 (!%p255_p3), %v1003_v2  ;;  %546 = vmatprep.mubr.bf16.mxu1 (!%p255_p3), %v1003_v2  ;;  %v958_v3 = vld [vmem:[%s1165_s3 + $0x14] ss:$8 sps:$4 sm:$0xff] (!%p255_p3)   ;;  %v960_v4 = vld [vmem:[%s1165_s3 + $0x10] ss:$8 sps:$4 sm:$0xff] (!%p255_p3)  }
   0x8   : > { %494 = vmatprep.subr.bf16.mxu0 (!%p255_p3), %v955_v0  ;;  %914 = vmatprep.subr.bf16.mxu1 (!%p255_p3), %v955_v0  ;;  %v961_v5 = vld [vmem:[%s1165_s3 + $0x24] ss:$8 sps:$4 sm:$0xff] (!%p255_p3)   ;;  %v963_v6 = vld [vmem:[%s1165_s3 + $0x20] ss:$8 sps:$4 sm:$0xff] (!%p255_p3)   ;;  %v964_v7 = vld [vmem:[%s1165_s3 + $0x34] ss:$8 sps:$4 sm:$0xff] (!%p255_p3)  }
   0x9   : > { %495 = vmatpush1.bf16.msra.mxu0 (!%p255_p3), %v957_v1  ;;  %922 = vmatpush1.bf16.msra.mxu1 (!%p255_p3), %v957_v1  ;;  %v966_v8 = vld [vmem:[%s1165_s3 + $0x30] ss:$8 sps:$4 sm:$0xff] (!%p255_p3)   ;;  %v967_v9 = vld [vmem:[%s1165_s3 + $0x44] ss:$8 sps:$4 sm:$0xff] (!%p255_p3)   ;;  %v969_v10 = vld [vmem:[%s1165_s3 + $0x40] ss:$8 sps:$4 sm:$0xff] (!%p255_p3)  }
   0xa   : > { %496 = vmatprep.subr.bf16.mxu0 (!%p255_p3), %v958_v3  ;;  %915 = vmatprep.subr.bf16.mxu1 (!%p255_p3), %v958_v3  ;;  %v970_v11 = vld [vmem:[%s1165_s3 + $0x54] ss:$8 sps:$4 sm:$0xff] (!%p255_p3)   ;;  %v972_v12 = vld [vmem:[%s1165_s3 + $0x50] ss:$8 sps:$4 sm:$0xff] (!%p255_p3)   ;;  %v973_v18 = vld [vmem:[%s1165_s3 + $0x64] ss:$8 sps:$4 sm:$0xff] (!%p255_p3)  }
   0xb   : > { %v975_v23 = vld [vmem:[%s1165_s3 + $0x60] ss:$8 sps:$4 sm:$0xff] (!%p255_p3)   ;;  %v976_v25 = vld [vmem:[%s1165_s3 + $0x74] ss:$8 sps:$4 sm:$0xff] (!%p255_p3)   ;;  %v978_v32 = vld [vmem:[%s1165_s3 + $0x70] ss:$8 sps:$4 sm:$0xff] (!%p255_p3)  }
   0xc   : > { %v405_v48 = vshrl.u32 (!%p255_p3), %v404_v47, 7  ;;  %v402_v50 = vld [vmem:[%s1166_s4] sm:$0x3] (!%p255_p3) }
   0xd   : > { %497 = vmatpush1.bf16.msra.mxu0 (!%p255_p3), %v960_v4  ;;  %923 = vmatpush1.bf16.msra.mxu1 (!%p255_p3), %v960_v4 }
   0xe   : > { %498 = vmatprep.subr.bf16.mxu0 %v961_v5  ;;  %916 = vmatprep.subr.bf16.mxu1 %v961_v5  ;;  %s1174_s21 = smov (!%p308_p4, %s993_s21), 1  ;;  %v406_v49 = vsub.s32 0, %v405_v48  ;;  %v410_v51 = vsub.s32 1, %v405_v48 }
   0xf   : > { %s849_s19 = sshll.u32 %s1174_s21, 6  ;;  %s319_s9 = scalar_lea.vmem %s1163_s1, %s1174_s21 }
  0x10   : > { %s1099_s28 = scalar_lea.vmem %s1162_s0, %s849_s19  ;;  %v813_v15 = vld [vmem:[%s319_s9] ss:$0 sm:$0xff]  ;;  %s322_s16 = scalar_lea.vmem %s1164_s2, %s1174_s21  ;;  %v407_v52 = vrot.slane %v402_v50, %v406_v49  ;;  %v411_v55 = vrot.slane %v402_v50, %v410_v51 }
  0x11   : > { %499 = vmatpush1.bf16.msra.mxu0 %v963_v6  ;;  %924 = vmatpush1.bf16.msra.mxu1 %v963_v6  ;;  %v344_v13 = vld [vmem:[%s1099_s28] sm:$0xff]  ;;  %v345_v14 = vld [vmem:[%s1099_s28 + $0x8] sm:$0xff]  ;;  %v346_v30 = vld [vmem:[%s1099_s28 + $0x10] sm:$0xff]  ;;  %s850_s29 = sshll.u32 %s1174_s21, 5 }
  0x12   : > { %500 = vmatprep.subr.bf16.mxu0 %v964_v7  ;;  %917 = vmatprep.subr.bf16.mxu1 %v964_v7  ;;  %v348_v16 = vld [vmem:[%s1099_s28 + $0x20] sm:$0xff]  ;;  %v349_v17 = vld [vmem:[%s1099_s28 + $0x28] sm:$0xff]  ;;  %v359_v19 = vsub.f32 %v344_v13, %v813_v15  ;;  %v360_v20 = vsub.f32 %v345_v14, %v813_v15  ;;  %v347_v31 = vld [vmem:[%s1099_s28 + $0x18] sm:$0xff]  ;;  %v361_v35 = vsub.f32 %v346_v30, %v813_v15  ;;  %s1144_s8 = scalar_lea.vmem %s1167_s5, %s850_s29  ;;  %s341_s10 = scalar_lea.vmem %s1168_s6, %s850_s29 }
  0x13   : > { %v363_v21 = vsub.f32 %v348_v16, %v813_v15  ;;  %v364_v22 = vsub.f32 %v349_v17, %v813_v15  ;;  %v814_v24 = vld [vmem:[%s322_s16] ss:$0 sm:$0xff]  ;;  %v350_v33 = vld [vmem:[%s1099_s28 + $0x30] sm:$0xff]  ;;  %v351_v34 = vld [vmem:[%s1099_s28 + $0x38] sm:$0xff]  ;;  %v362_v36 = vsub.f32 %v347_v31, %v813_v15 }
  0x14   : > { %v374_v26 = vmul.f32 %v814_v24, %v359_v19  ;;  %v375_v27 = vmul.f32 %v814_v24, %v360_v20  ;;  %v365_v39 = vsub.f32 %v350_v33, %v813_v15  ;;  %v366_v40 = vsub.f32 %v351_v34, %v813_v15 }
  0x15   : > { %501 = vmatpush1.bf16.msra.mxu0 %v966_v8  ;;  %925 = vmatpush1.bf16.msra.mxu1 %v966_v8  ;;  %v378_v28 = vmul.f32 %v814_v24, %v363_v21  ;;  %v379_v29 = vmul.f32 %v814_v24, %v364_v22  ;;  %v376_v41 = vmul.f32 %v814_v24, %v361_v35 }
  0x16   : > { %502 = vmatprep.subr.bf16.mxu0 %v967_v9  ;;  %918 = vmatprep.subr.bf16.mxu1 %v967_v9  ;;  %v382_v37 = vpack.c.bf16 %v375_v27, %v374_v26  ;;  %v377_v42 = vmul.f32 %v814_v24, %v362_v36  ;;  %v380_v43 = vmul.f32 %v814_v24, %v365_v39 }
  0x17   : > { %v384_v38 = vpack.c.bf16 %v379_v29, %v378_v28  ;;  %v381_v44 = vmul.f32 %v814_v24, %v366_v40 }
  0x18   : > { %v383_v45 = vpack.c.bf16 %v377_v42, %v376_v41 }
  0x19   : > { %503 = vmatpush1.bf16.msra.mxu0 %v969_v10  ;;  %926 = vmatpush1.bf16.msra.mxu1 %v969_v10  ;;  %v385_v46 = vpack.c.bf16 %v381_v44, %v380_v43 }
  0x1a   : > { %504 = vmatprep.subr.bf16.mxu0 %v970_v11  ;;  %919 = vmatprep.subr.bf16.mxu1 %v970_v11 }
  0x1d   : > { %505 = vmatpush1.bf16.msra.mxu0 %v972_v12  ;;  %927 = vmatpush1.bf16.msra.mxu1 %v972_v12 }
  0x1e   : > { %506 = vmatprep.subr.bf16.mxu0 %v973_v18  ;;  %920 = vmatprep.subr.bf16.mxu1 %v973_v18 }
  0x21   : > { %507 = vmatpush1.bf16.msra.mxu0 %v975_v23  ;;  %928 = vmatpush1.bf16.msra.mxu1 %v975_v23 }
  0x22   : > { %508 = vmatprep.subr.bf16.mxu0 %v976_v25  ;;  %921 = vmatprep.subr.bf16.mxu1 %v976_v25 }
  0x25   : > { %509 = vmatpush1.bf16.msra.mxu0 %v978_v32  ;;  %929 = vmatpush1.bf16.msra.mxu1 %v978_v32 }
  0x28   : > { %527 = vmatmul.mubr.bf16.vlgmr.msra.gmra.mrb[0].mxu0 %v382_v37  ;;  %547 = vmatmul.mubr.bf16.vlgmr.msra.gmra.mrb[0].mxu1 %v384_v38 }
  0x29   : > { %536 = vmatprep.mubr.bf16.mxu0 %v1003_v2  ;;  %556 = vmatprep.mubr.bf16.mxu1 %v1003_v2 }
  0x30   : > { %537 = vmatmul.mubr.bf16.gmra.mrb[4].mxu0 %v383_v45  ;;  %557 = vmatmul.mubr.bf16.gmra.mrb[4].mxu1 %v385_v46 }
  0xfb   : > { %v528_v53 = vpop.f32.mrb[0].mxu0  ;;  %v548_v54 = vpop.f32.mrb[0].mxu1 }
  0xfc   : > { %v530_v56 = vpop.f32.mrb[1].mxu0  ;;  %v550_v57 = vpop.f32.mrb[1].mxu1  ;;  %v529_v60 = vadd.f32 %v528_v53, %v407_v52  ;;  %v549_v61 = vadd.f32 %v548_v54, %v407_v52 }
  0xfd   : > { %v532_v58 = vpop.f32.mrb[2].mxu0  ;;  %v552_v59 = vpop.f32.mrb[2].mxu1  ;;  %v531_v2 = vadd.f32 %v530_v56, %v411_v55  ;;  %v551_v3 = vadd.f32 %v550_v57, %v411_v55 }
  0xfe   : > { %v533_v62 = vadd.f32 %v532_v58, %v407_v52  ;;  %v553_v63 = vadd.f32 %v552_v59, %v407_v52  ;;  %v534_v0 = vpop.f32.mrb[3].mxu0  ;;  %v554_v1 = vpop.f32.mrb[3].mxu1 }
  0xff   : > { %v535_v4 = vadd.f32 %v534_v0, %v411_v55  ;;  %v555_v5 = vadd.f32 %v554_v1, %v411_v55 }
 0x100   : > { %v871_v6 = vpack.c.bf16 %v533_v62, %v529_v60  ;;  %v881_v7 = vpack.c.bf16 %v553_v63, %v549_v61 }
 0x101   : > { %v891_v8 = vpack.c.bf16 %v535_v4, %v531_v2  ;;  %v901_v9 = vpack.c.bf16 %v555_v5, %v551_v3 }
 0x102   : > { %872 = vst [vmem:[%s1144_s8] sm:$0xff] %v871_v6   ;;  %909 = vst [vmem:[%s1144_s8 + $0x10] sm:$0xff] %v881_v7  }
 0x103   : > { %892 = vst [vmem:[%s341_s10] sm:$0xff] %v891_v8   ;;  %912 = vst [vmem:[%s341_s10 + $0x10] sm:$0xff] %v901_v9   ;;  %v538_v10 = vpop.f32.mrb[4].mxu0  ;;  %v558_v11 = vpop.f32.mrb[4].mxu1 }
 0x104   : > { %v540_v12 = vpop.f32.mrb[5].mxu0  ;;  %v560_v13 = vpop.f32.mrb[5].mxu1  ;;  %v539_v16 = vadd.f32 %v538_v10, %v407_v52  ;;  %v559_v17 = vadd.f32 %v558_v11, %v407_v52 }
 0x105   : > { %v542_v14 = vpop.f32.mrb[6].mxu0  ;;  %v562_v15 = vpop.f32.mrb[6].mxu1  ;;  %v541_v22 = vadd.f32 %v540_v12, %v411_v55  ;;  %v561_v23 = vadd.f32 %v560_v13, %v411_v55 }
 0x106   : > { %v543_v18 = vadd.f32 %v542_v14, %v407_v52  ;;  %v563_v19 = vadd.f32 %v562_v15, %v407_v52  ;;  %v544_v20 = vpop.f32.mrb[7].mxu0  ;;  %v564_v21 = vpop.f32.mrb[7].mxu1 }
 0x107   : > { %v545_v24 = vadd.f32 %v544_v20, %v411_v55  ;;  %v565_v25 = vadd.f32 %v564_v21, %v411_v55 }
 0x108   : > { %v876_v26 = vpack.c.bf16 %v543_v18, %v539_v16  ;;  %v886_v27 = vpack.c.bf16 %v563_v19, %v559_v17 }
 0x109   : > { %v896_v28 = vpack.c.bf16 %v545_v24, %v541_v22  ;;  %v906_v29 = vpack.c.bf16 %v565_v25, %v561_v23 }
 0x10a   : > { %908 = vst [vmem:[%s1144_s8 + $0x8] sm:$0xff] %v876_v26   ;;  %910 = vst [vmem:[%s1144_s8 + $0x18] sm:$0xff] %v886_v27  }
 0x10b   : > { %911 = vst [vmem:[%s341_s10 + $0x8] sm:$0xff] %v896_v28   ;;  %913 = vst [vmem:[%s341_s10 + $0x18] sm:$0xff] %v906_v29  }
 0x10c PF: > { %s17_s23 = sadd.s32 1, %s1001_s23   ;;  %s1169_s21 = smov %s997_s22 }
 0x10d   : > { %p14_p5 = scmp.ge.s32.totalorder %s17_s23, 4   ;;  %s1170_s22 = smov %s1172_s24 }
 0x10f   :  { %16 = sbr.rel (!%p14_p5) target bundleno = 2 (0x2), region = 88 }

// kernel: attn_block_forward.5
= control target key start
LH: loop header
LB: loop body
LE: loop exit
PB: predicated region body
PF: predicated region fallthrough
CT: control target
= control target key end

     0   :  { %s1907_s30 = smov 0   ;;  %s1909_s10 = smov 0   ;;  %s2250_s0 = inlined_call_operand.vmem [shape: f32[2,64,128], index: 0, kind: input, shape index: {}, may-alias: {0,9}]   ;;  %s2251_s1 = inlined_call_operand.vmem [shape: f32[2,1,128], index: 1, kind: input, shape index: {}]   ;;  %s2252_s2 = inlined_call_operand.vmem [shape: f32[2,1,128], index: 2, kind: input, shape index: {}]   ;;  %s2253_s3 = inlined_call_operand.vmem [shape: bf16[128,128], index: 3, kind: input, shape index: {}]   ;;  %s2254_s4 = inlined_call_operand.vmem [shape: f32[1,128], index: 4, kind: input, shape index: {}]   ;;  %s2255_s5 = inlined_call_operand.vmem [shape: bf16[2,64,128], index: 5, kind: input, shape index: {}]   ;;  %s2256_s6 = inlined_call_operand.vmem [shape: bf16[2,64,128], index: 6, kind: input, shape index: {}]   ;;  %s2257_s7 = inlined_call_operand.vmem [shape: bf16[128,128], index: 7, kind: input, shape index: {}]   ;;  %s2258_s8 = inlined_call_operand.vmem [shape: f32[1,128], index: 8, kind: input, shape index: {}]   ;;  %s2259_s9 = inlined_call_operand.vmem [shape: f32[2,64,128], index: 9, kind: output, shape index: {}, may-alias: {0,9}]  }
   0x1   :  { %s1911_s11 = smov 0  }
   0x2 LB: > { %s38_s12 = sadd.s32 1, %s1848_s10  ;;  %p1562_p0 = scmp.ge.s32.totalorder %s1852_s11, 1  ;;  %s1852_s11 = sphi %s1911_s11, %s19_s11   ;;  %s1848_s10 = sphi %s1909_s10, %s2261_s10   ;;  %s1844_s30 = sphi %s1907_s30, %s2260_s30  }
   0x3   : > { %p40_p1 = scmp.ge.s32.totalorder %s38_s12, 2  ;;  %p365_p2 = scmp.lt.s32.totalorder %s1852_s11, 3 }
   0x5   : > { %s2263_s12 = smov (%p40_p1, %s38_s12), 0  ;;  %p366_p3 = pnand %p1562_p0, %p365_p2 }
   0x6   : > { %v1758_v0 = vld [vmem:[%s2253_s3] sm:$0xff] (!%p366_p3)   ;;  %p434_p4 = scmp.lt.s32.totalorder (!%p366_p3), %s1844_s30, 1  ;;  %v1759_v1 = vld [vmem:[%s2253_s3 + $0x8] sm:$0xff] (!%p366_p3)   ;;  %v1760_v2 = vld [vmem:[%s2253_s3 + $0x10] sm:$0xff] (!%p366_p3)   ;;  %vm670_vm0 = vcmask (!%p366_p3), 7168   ;;  %v1854_v63 = vmov (!%p366_p3), -inf  }
   0x7   : > { %369 = sbr.rel (%p366_p3) target bundleno = 1303 (0x517), region = 56  ;;  %1649 = vmatprep.subr.bf16.mxu0 (!%p366_p3), %v1758_v0  ;;  %v1761_v3 = vld [vmem:[%s2253_s3 + $0x18] sm:$0xff] (!%p366_p3)   ;;  %v1762_v10 = vld [vmem:[%s2253_s3 + $0x20] sm:$0xff] (!%p366_p3)   ;;  %v1763_v16 = vld [vmem:[%s2253_s3 + $0x28] sm:$0xff] (!%p366_p3)   ;;  %673 = vst.msk [vmem:[#allocation3 + $0x10] sm:$0xff] (!%p366_p3), %vm670_vm0, %v1854_v63  ;;  %vm804_vm1 = vcmask (!%p366_p3), 523264  }
   0x8   : > { %1650 = vmatpush3.bf16.msra.mxu0 (!%p366_p3), %v1758_v0  ;;  %v1764_v19 = vld [vmem:[%s2253_s3 + $0x30] sm:$0xff] (!%p366_p3)   ;;  %v1765_v27 = vld [vmem:[%s2253_s3 + $0x38] sm:$0xff] (!%p366_p3)   ;;  %v1573_v43 = vld [vmem:[%s2254_s4] ss:$0 sm:$0xff] (!%p366_p3)  ;;  %671 = vst.msk [vmem:[#allocation3] sm:$0xff] (!%p366_p3), %vm670_vm0, %v1854_v63 }
   0x9   : > { %1651 = vmatprep.subr.bf16.mxu0 (!%p366_p3), %v1759_v1  ;;  %672 = vst.msk [vmem:[#allocation3 + $0x8] sm:$0xff] (!%p366_p3), %vm670_vm0, %v1854_v63  ;;  %674 = vst.msk [vmem:[#allocation3 + $0x18] sm:$0xff] (!%p366_p3), %vm670_vm0, %v1854_v63 }
   0xa   : > { %675 = vst.msk [vmem:[#allocation3 + $0x20] sm:$0xff] (!%p366_p3), %vm670_vm0, %v1854_v63  ;;  %676 = vst.msk [vmem:[#allocation3 + $0x28] sm:$0xff] (!%p366_p3), %vm670_vm0, %v1854_v63 }
   0xb   : > { %677 = vst.msk [vmem:[#allocation3 + $0x30] sm:$0xff] (!%p366_p3), %vm670_vm0, %v1854_v63  ;;  %678 = vst.msk [vmem:[#allocation3 + $0x38] sm:$0xff] (!%p366_p3), %vm670_vm0, %v1854_v63 }
   0xc   : > { %1652 = vmatpush3.bf16.msra.mxu0 (!%p366_p3), %v1759_v1 }
   0xd   : > { %1653 = vmatprep.subr.bf16.mxu0 (!%p366_p3), %v1760_v2 }
   0xe   : > { %s2265_s30 = smov (!%p434_p4, %s1844_s30), 1 }
   0xf   : > { %s1605_s19 = sshll.u32 %s2265_s30, 6  ;;  %s445_s25 = scalar_lea.vmem %s2251_s1, %s2265_s30 }
  0x10   : > { %s1942_s22 = scalar_lea.vmem %s2250_s0, %s1605_s19  ;;  %s448_s28 = scalar_lea.vmem %s2252_s2, %s2265_s30  ;;  %v1571_v6 = vld [vmem:[%s445_s25] ss:$0 sm:$0xff]  ;;  %1654 = vmatpush3.bf16.msra.mxu0 %v1760_v2 }
  0x11   : > { %s1606_s29 = sshll.u32 %s2265_s30, 5  ;;  %v1957_v4 = vld [vmem:[%s1942_s22] sm:$0xff]  ;;  %v1960_v5 = vld [vmem:[%s1942_s22 + $0x8] sm:$0xff]  ;;  %1655 = vmatprep.subr.bf16.mxu0 %v1761_v3  ;;  %v1983_v17 = vld [vmem:[%s1942_s22 + $0x10] sm:$0xff]  ;;  %s477_s20 = scalar_lea.vmem %s2259_s9, %s1605_s19 }
  0x12   : > { %v499_v7 = vsub.f32 %v1957_v4, %v1571_v6  ;;  %v500_v8 = vsub.f32 %v1960_v5, %v1571_v6  ;;  %v1572_v9 = vld [vmem:[%s448_s28] ss:$0 sm:$0xff]  ;;  %s1967_s17 = scalar_lea.vmem %s2255_s5, %s1606_s29  ;;  %s1980_s26 = scalar_lea.vmem %s2256_s6, %s1606_s29  ;;  %v1986_v18 = vld [vmem:[%s1942_s22 + $0x18] sm:$0xff]  ;;  %v1995_v21 = vld [vmem:[%s1942_s22 + $0x28] sm:$0xff]  ;;  %v501_v23 = vsub.f32 %v1983_v17, %v1571_v6 }
  0x13   : > { %v1766_v13 = vld [vmem:[%s1967_s17] sm:$0xff]   ;;  %v1767_v15 = vld [vmem:[%s1967_s17 + $0x8] sm:$0xff]   ;;  %v1768_v22 = vld [vmem:[%s1967_s17 + $0x10] sm:$0xff]   ;;  %v502_v24 = vsub.f32 %v1986_v18, %v1571_v6  ;;  %v504_v26 = vsub.f32 %v1995_v21, %v1571_v6 }
  0x14   : > { %v514_v11 = vmul.f32 %v1572_v9, %v499_v7  ;;  %v515_v12 = vmul.f32 %v1572_v9, %v500_v8  ;;  %1673 = vmatprep.subr.bf16.mxu1 %v1766_v13  ;;  %1656 = vmatpush3.bf16.msra.mxu0 %v1761_v3  ;;  %v1992_v20 = vld [vmem:[%s1942_s22 + $0x20] sm:$0xff]  ;;  %v516_v28 = vmul.f32 %v1572_v9, %v501_v23  ;;  %v2006_v32 = vld [vmem:[%s1942_s22 + $0x30] sm:$0xff]  ;;  %v2009_v33 = vld [vmem:[%s1942_s22 + $0x38] sm:$0xff]  ;;  %v1856_v23 = vmov 0.0  }
  0x15   : > { %1657 = vmatprep.subr.bf16.mxu0 %v1762_v10  ;;  %1674 = vmatpush3.bf16.xpose.msra.mxu1 %v1766_v13  ;;  %v503_v25 = vsub.f32 %v1992_v20, %v1571_v6  ;;  %v517_v29 = vmul.f32 %v1572_v9, %v502_v24  ;;  %v519_v31 = vmul.f32 %v1572_v9, %v504_v26  ;;  %v1769_v41 = vld [vmem:[%s1967_s17 + $0x18] sm:$0xff]   ;;  %v2065_v24 = vld [vmem:[#allocation3 + $0x10] sm:$0xff] }
  0x16   : > { %v522_v14 = vpack.c.bf16 %v515_v12, %v514_v11  ;;  %1675 = vmatprep.subr.bf16.mxu1 %v1767_v15  ;;  %v505_v35 = vsub.f32 %v2006_v32, %v1571_v6  ;;  %v506_v36 = vsub.f32 %v2009_v33, %v1571_v6  ;;  %679 = vst.msk [vmem:[#allocation4] sm:$0xff] %vm670_vm0, %v1856_v23  ;;  %680 = vst.msk [vmem:[#allocation4 + $0x8] sm:$0xff] %vm670_vm0, %v1856_v23 }
  0x17   : > { %v518_v30 = vmul.f32 %v1572_v9, %v503_v25  ;;  %v523_v34 = vpack.c.bf16 %v517_v29, %v516_v28  ;;  %681 = vst.msk [vmem:[#allocation4 + $0x10] sm:$0xff] %vm670_vm0, %v1856_v23  ;;  %682 = vst.msk [vmem:[#allocation4 + $0x18] sm:$0xff] %vm670_vm0, %v1856_v23  ;;  %v2067_v25 = vld [vmem:[#allocation3] sm:$0xff] }
  0x18   : > { %1665 = vmatprep.mubr.bf16.mxu0 %v522_v14  ;;  %1658 = vmatpush3.bf16.msra.mxu0 %v1762_v10  ;;  %v520_v38 = vmul.f32 %v1572_v9, %v505_v35  ;;  %v521_v39 = vmul.f32 %v1572_v9, %v506_v36  ;;  %683 = vst.msk [vmem:[#allocation4 + $0x20] sm:$0xff] %vm670_vm0, %v1856_v23  ;;  %684 = vst.msk [vmem:[#allocation4 + $0x28] sm:$0xff] %vm670_vm0, %v1856_v23 }
  0x19   : > { %1659 = vmatprep.subr.bf16.mxu0 %v1763_v16  ;;  %v524_v37 = vpack.c.bf16 %v519_v31, %v518_v30  ;;  %685 = vst.msk [vmem:[#allocation4 + $0x30] sm:$0xff] %vm670_vm0, %v1856_v23  ;;  %686 = vst.msk [vmem:[#allocation4 + $0x38] sm:$0xff] %vm670_vm0, %v1856_v23  ;;  %v2075_v30 = vld [vmem:[#allocation3 + $0x18] sm:$0xff] }
  0x1a   : > { %v525_v40 = vpack.c.bf16 %v521_v39, %v520_v38 }
  0x1c   : > { %1660 = vmatpush3.bf16.msra.mxu0 %v1763_v16 }
  0x1d   : > { %1661 = vmatprep.subr.bf16.mxu0 %v1764_v19  ;;  %1676 = vmatpush3.bf16.xpose.msra.mxu1 %v1767_v15 }
  0x1e   : > { %1677 = vmatprep.subr.bf16.mxu1 %v1768_v22 }
  0x20   : > { %1662 = vmatpush3.bf16.msra.mxu0 %v1764_v19 }
  0x21   : > { %1663 = vmatprep.subr.bf16.mxu0 %v1765_v27 }
  0x24   : > { %1664 = vmatpush3.bf16.msra.mxu0 %v1765_v27 }
  0x25   : > { %1678 = vmatpush3.bf16.xpose.msra.mxu1 %v1768_v22  ;;  %v1855_v22 = vmov 0  }
  0x26   : > { %1679 = vmatprep.subr.bf16.mxu1 %v1769_v41  ;;  %1756 = vset.pattern.permute.xlu0 %v1855_v22 }
  0x27   : > { %1666 = vmatmul.mubr.bf16.vlgmr.msra.gmra.mrb[0].mxu0 %v523_v34  ;;  %1757 = vset.pattern.permute.xlu1 %v1855_v22  ;;  %v2082_v34 = vld [vmem:[#allocation3 + $0x8] sm:$0xff] }
  0x28   : > { %1669 = vmatprep.mubr.bf16.mxu0 %v524_v37 }
  0x2d   : > { %1680 = vmatpush3.bf16.xpose.msra.mxu1 %v1769_v41  ;;  %v2100_v41 = vld [vmem:[#allocation3 + $0x20] sm:$0xff] }
  0x2f   : > { %1670 = vmatmul.mubr.bf16.gmra.mrb[4].mxu0 %v525_v40 }
  0xfa   : > { %v1667_v42 = vpop.f32.mrb[0].mxu0 }
  0xfb   : > { %v631_v44 = vpop.f32.mrb[1].mxu0  ;;  %v640_v46 = vadd.f32 %v1667_v42, %v1573_v43 }
  0xfc   : > { %v1668_v45 = vpop.f32.mrb[2].mxu0  ;;  %v632_v49 = vadd.f32 %v1573_v43, %v631_v44  ;;  %v2106_v44 = vld [vmem:[#allocation3 + $0x28] sm:$0xff] }
  0xfd   : > { %v643_v47 = vadd.f32 %v1668_v45, %v1573_v43  ;;  %v634_v48 = vpop.f32.mrb[3].mxu0 }
  0xfe   : > { %v635_v50 = vadd.f32 %v1573_v43, %v634_v48  ;;  %v1770_v48 = vld [vmem:[%s1980_s26] sm:$0xff]  }
  0xff   : > { %v663_v51 = vpack.c.bf16 %v643_v47, %v640_v46  ;;  %v2112_v47 = vld [vmem:[#allocation3 + $0x30] sm:$0xff]  ;;  %1689 = vmatprep.subr.bf16.mxu0 %v1770_v48 }
 0x100   : > { %v662_v52 = vpack.c.bf16 %v635_v50, %v632_v49  ;;  %1690 = vmatpush3.bf16.msra.mxu0 %v1770_v48 }
 0x102   : > { %v1671_v53 = vpop.f32.mrb[4].mxu0  ;;  %1681 = vmatprep.mubr.bf16.mxu1 %v662_v52  ;;  %v2122_v52 = vld [vmem:[#allocation3 + $0x38] sm:$0xff] }
 0x103   : > { %v656_v54 = vadd.f32 %v1671_v53, %v1573_v43  ;;  %v647_v55 = vpop.f32.mrb[5].mxu0  ;;  %1682 = vmatmul.mubr.bf16.vlgmr.msra.gmra.mrb[0].mxu1 %v663_v51 }
 0x104   : > { %v648_v56 = vadd.f32 %v1573_v43, %v647_v55  ;;  %v1672_v57 = vpop.f32.mrb[6].mxu0 }
 0x105   : > { %v659_v58 = vadd.f32 %v1672_v57, %v1573_v43  ;;  %v650_v59 = vpop.f32.mrb[7].mxu0 }
 0x106   : > { %v651_v60 = vadd.f32 %v1573_v43, %v650_v59 }
 0x107   : > { %v665_v61 = vpack.c.bf16 %v659_v58, %v656_v54 }
 0x108   : > { %v664_v62 = vpack.c.bf16 %v651_v60, %v648_v56  ;;  %v1771_v56 = vld [vmem:[%s1980_s26 + $0x8] sm:$0xff]   ;;  %v1772_v60 = vld [vmem:[%s1980_s26 + $0x10] sm:$0xff]  }
 0x109   : > { %1691 = vmatprep.subr.bf16.mxu0 %v1771_v56 }
 0x10a   : > { %1685 = vmatprep.mubr.bf16.mxu1 %v664_v62  ;;  %1692 = vmatpush3.bf16.msra.mxu0 %v1771_v56 }
 0x10b   : > { %1686 = vmatmul.mubr.bf16.gmra.mrb[4].mxu1 %v665_v61  ;;  %1693 = vmatprep.subr.bf16.mxu0 %v1772_v60  ;;  %v1773_v61 = vld [vmem:[%s1980_s26 + $0x18] sm:$0xff]  }
 0x10e   : > { %1694 = vmatpush3.bf16.msra.mxu0 %v1772_v60 }
 0x10f   : > { %1695 = vmatprep.subr.bf16.mxu0 %v1773_v61 }
 0x112   : > { %1696 = vmatpush3.bf16.msra.mxu0 %v1773_v61 }
 0x1d6   : > { %v2025_v0 = vpop.f32.mrb[0].mxu1 }
 0x1d7   : > { %v2027_v1 = vpop.f32.mrb[1].mxu1  ;;  %v811_v2 = vsel %vm804_vm1, %v2025_v0, -inf }
 0x1d8   : > { %812 = vmax.xlane.f32.xlu1 %v811_v2  ;;  %v2031_v3 = vpop.f32.mrb[2].mxu1  ;;  %v805_v6 = vsel %vm804_vm1, %v2027_v1, -inf }
 0x1d9   : > { %806 = vmax.xlane.f32.xlu0 %v805_v6  ;;  %v2035_v7 = vpop.f32.mrb[3].mxu1  ;;  %v814_v8 = vsel %vm804_vm1, %v2031_v3, -inf }
 0x1da   : > { %v808_v9 = vsel %vm804_vm1, %v2035_v7, -inf }
 0x1dc   : > { %815 = vmax.xlane.f32.xlu1 %v814_v8 }
 0x1dd   : > { %809 = vmax.xlane.f32.xlu0 %v808_v9 }
 0x1de   : > { %v2041_v10 = vpop.f32.mrb[4].mxu1 }
 0x1df   : > { %v2043_v11 = vpop.f32.mrb[5].mxu1  ;;  %v823_v16 = vsel %vm804_vm1, %v2041_v10, -inf }
 0x1e0   : > { %v2045_v12 = vpop.f32.mrb[6].mxu1  ;;  %v817_v13 = vsel %vm804_vm1, %v2043_v11, -inf }
 0x1e1   : > { %818 = vmax.xlane.f32.xlu0 %v817_v13  ;;  %v2049_v14 = vpop.f32.mrb[7].mxu1  ;;  %v826_v19 = vsel %vm804_vm1, %v2045_v12, -inf }
 0x1e2   : > { %v820_v15 = vsel %vm804_vm1, %v2049_v14, -inf }
 0x1e3   : > { %821 = vmax.xlane.f32.xlu1 %v820_v15 }
 0x1e5   : > { %824 = vmax.xlane.f32.xlu0 %v823_v16 }
 0x1e7   : > { %827 = vmax.xlane.f32.xlu1 %v826_v19 }
 0x265   : > { %v813_v26 = vpop.xlane.xlu1 %812 }
 0x266   : > { %v2070_v27 = vmax.f32 %v2065_v24, %v813_v26  ;;  %v807_v28 = vpop.xlane.xlu0 %806 }
 0x267   : > { %v2073_v29 = vmax.f32 %v2067_v25, %v807_v28 }
 0x268   : > { %v839_v31 = vsub.f32 %v2065_v24, %v2070_v27  ;;  %1169 = vst.msk [vmem:[#allocation3 + $0x10] sm:$0xff] %vm670_vm0, %v2070_v27  ;;  %873 = vperm.xlu1 %1757, %v2070_v27  }
 0x269   : > { %v837_v35 = vsub.f32 %v2067_v25, %v2073_v29  ;;  %1167 = vst.msk [vmem:[#allocation3] sm:$0xff] %vm670_vm0, %v2073_v29  ;;  %v816_v36 = vpop.xlane.xlu1 %815  ;;  %863 = vperm.xlu0 %1756, %v2073_v29  }
 0x26a   : > { %v2090_v37 = vmax.f32 %v2075_v30, %v816_v36  ;;  %v810_v38 = vpop.xlane.xlu0 %809 }
 0x26b   : > { %v2093_v39 = vmax.f32 %v2082_v34, %v810_v38 }
 0x26c   : > { %v840_v40 = vsub.f32 %v2075_v30, %v2090_v37  ;;  %1170 = vst.msk [vmem:[#allocation3 + $0x18] sm:$0xff] %vm670_vm0, %v2090_v37  ;;  %878 = vperm.xlu1 %1757, %v2090_v37   ;;  %v1774_v37 = vld [vmem:[%s2257_s7] sm:$0xff]  }
 0x26d   : > { %v838_v42 = vsub.f32 %v2082_v34, %v2093_v39  ;;  %1168 = vst.msk [vmem:[#allocation3 + $0x8] sm:$0xff] %vm670_vm0, %v2093_v39  ;;  %1705 = vmatprep.subr.bf16.mxu1 %v1774_v37 }
 0x26e   : > { %v819_v43 = vpop.xlane.xlu0 %818  ;;  %1706 = vmatpush3.bf16.msra.mxu1 %v1774_v37 }
 0x26f   : > { %v2109_v45 = vmax.f32 %v2100_v41, %v819_v43 }
 0x270   : > { %868 = vperm.xlu1 %1757, %v2093_v39   ;;  %v822_v46 = vpop.xlane.xlu1 %821  ;;  %v1775_v39 = vld [vmem:[%s2257_s7 + $0x8] sm:$0xff]  }
 0x271   : > { %v841_v49 = vsub.f32 %v2100_v41, %v2109_v45  ;;  %1171 = vst.msk [vmem:[#allocation3 + $0x20] sm:$0xff] %vm670_vm0, %v2109_v45  ;;  %v2120_v50 = vmax.f32 %v2106_v44, %v822_v46  ;;  %1707 = vmatprep.subr.bf16.mxu1 %v1775_v39  ;;  %v1777_v41 = vld [vmem:[%s2257_s7 + $0x18] sm:$0xff]  }
 0x272   : > { %v825_v51 = vpop.xlane.xlu0 %824  ;;  %1708 = vmatpush3.bf16.msra.mxu1 %v1775_v39 }
 0x273   : > { %v842_v53 = vsub.f32 %v2106_v44, %v2120_v50  ;;  %1172 = vst.msk [vmem:[#allocation3 + $0x28] sm:$0xff] %vm670_vm0, %v2120_v50  ;;  %v2129_v54 = vmax.f32 %v2112_v47, %v825_v51  ;;  %v853_v34 = vmul.f32 1.442695, %v841_v49  ;;  %v928_v49 = vld [vmem:[#allocation4 + $0x18] sm:$0xff] }
 0x274   : > { %v828_v55 = vpop.xlane.xlu1 %827 }
 0x275   : > { %v843_v57 = vsub.f32 %v2112_v47, %v2129_v54  ;;  %1173 = vst.msk [vmem:[#allocation3 + $0x30] sm:$0xff] %vm670_vm0, %v2129_v54  ;;  %v2137_v58 = vmax.f32 %v2122_v52, %v828_v55  ;;  %893 = vperm.xlu1 %1757, %v2129_v54   ;;  %v855_v25 = vmul.f32 1.442695, %v842_v53 }
 0x277   : > { %v844_v59 = vsub.f32 %v2122_v52, %v2137_v58  ;;  %1174 = vst.msk [vmem:[#allocation3 + $0x38] sm:$0xff] %vm670_vm0, %v2137_v58  ;;  %v857_v53 = vmul.f32 1.442695, %v843_v57 }
 0x279   : > { %883 = vperm.xlu1 %1757, %v2109_v45  }
 0x27d   : > { %888 = vperm.xlu1 %1757, %v2120_v50  }
 0x281   : > { %898 = vperm.xlu1 %1757, %v2137_v58  }
 0x2e7   : > { %v874_v62 = vpop.permute.xlu1 %873 }
 0x2e8   : > { %v903_v63 = vsub.f32 %v2025_v0, %v874_v62  ;;  %v864_v2 = vpop.permute.xlu0 %863 }
 0x2e9   : > { %v901_v6 = vsub.f32 %v2027_v1, %v864_v2 }
 0x2ea   : > { %v913_v8 = vmul.f32 1.442695, %v903_v63 }
 0x2eb   : > { %v909_v9 = vmul.f32 1.442695, %v901_v6  ;;  %v879_v13 = vpop.permute.xlu1 %878 }
 0x2ec   : > { %v904_v15 = vsub.f32 %v2031_v3, %v879_v13 }
 0x2ed   : > { %1782 = vpow2.f32 %v909_v9 }
 0x2ee   : > { %v915_v16 = vmul.f32 1.442695, %v904_v15  ;;  %1784 = vpow2.f32 %v913_v8 }
 0x2ef   : > { %v869_v19 = vpop.permute.xlu1 %868 }
 0x2f0   : > { %1786 = vpow2.f32 %v915_v16  ;;  %v902_v22 = vsub.f32 %v2035_v7, %v869_v19 }
 0x2f2   : > { %v911_v23 = vmul.f32 1.442695, %v902_v22 }
 0x2f4   : > { %1788 = vpow2.f32 %v911_v23  ;;  %v894_v26 = vpop.permute.xlu1 %893 }
 0x2f5   : > { %v907_v0 = vsub.f32 %v2041_v10, %v894_v26  ;;  %v847_v26 = vmul.f32 1.442695, %v838_v42  ;;  %v925_v42 = vld [vmem:[#allocation4] sm:$0xff] }
 0x2f7   : > { %v1783_v28 = vpop.eup %1782  ;;  %v921_v48 = vmul.f32 1.442695, %v907_v0  ;;  %v849_v0 = vmul.f32 1.442695, %v839_v31 }
 0x2f8   : > { %v884_v36 = vpop.permute.xlu1 %883  ;;  %v941_v1 = vsel %vm804_vm1, %v1783_v28, 0.0  ;;  %v1785_v38 = vpop.eup %1784 }
 0x2f9   : > { %v905_v43 = vsub.f32 %v2043_v11, %v884_v36  ;;  %942 = vadd.xlane.f32.xlu1 %v941_v1  ;;  %v947_v6 = vsel %vm804_vm1, %v1785_v38, 0.0  ;;  %v851_v36 = vmul.f32 1.442695, %v840_v40  ;;  %v1776_v40 = vld [vmem:[%s2257_s7 + $0x10] sm:$0xff]  }
 0x2fa   : > { %v1787_v3 = vpop.eup %1786  ;;  %1709 = vmatprep.subr.bf16.mxu1 %v1776_v40 }
 0x2fb   : > { %v1039_v46 = vpack.c.bf16 %v1787_v3, %v1785_v38  ;;  %v917_v51 = vmul.f32 1.442695, %v905_v43  ;;  %v950_v55 = vsel %vm804_vm1, %v1787_v3, 0.0  ;;  %1710 = vmatpush3.bf16.msra.mxu1 %v1776_v40  ;;  %v926_v38 = vld [vmem:[#allocation4 + $0x8] sm:$0xff] }
 0x2fc   : > { %v889_v7 = vpop.permute.xlu1 %888  ;;  %1711 = vmatprep.subr.bf16.mxu1 %v1777_v41 }
 0x2fd   : > { %1790 = vpow2.f32 %v917_v51  ;;  %v906_v56 = vsub.f32 %v2049_v14, %v889_v7  ;;  %951 = vadd.xlane.f32.xlu1 %v950_v55  ;;  %v927_v55 = vld [vmem:[#allocation4 + $0x10] sm:$0xff] }
 0x2fe   : > { %v1789_v60 = vpop.eup %1788  ;;  %1792 = vpow2.f32 %v921_v48 }
 0x2ff   : > { %v919_v10 = vmul.f32 1.442695, %v906_v56  ;;  %v944_v61 = vsel %vm804_vm1, %v1789_v60, 0.0  ;;  %v1038_v62 = vpack.c.bf16 %v1789_v60, %v1783_v28  ;;  %v845_v28 = vmul.f32 1.442695, %v837_v35  ;;  %1712 = vmatpush3.bf16.msra.mxu1 %v1777_v41  ;;  %v929_v56 = vld [vmem:[#allocation4 + $0x20] sm:$0xff] }
 0x300   : > { %945 = vadd.xlane.f32.xlu0 %v944_v61  ;;  %v899_v11 = vpop.permute.xlu1 %898  ;;  %v930_v61 = vld [vmem:[#allocation4 + $0x28] sm:$0xff] }
 0x301   : > { %1794 = vpow2.f32 %v919_v10  ;;  %v908_v63 = vsub.f32 %v2045_v12, %v899_v11  ;;  %1697 = vmatprep.mubr.msk.bf16.mxu0 %vm804_vm1, %v1038_v62 }
 0x302   : > { %1698 = vmatmul.mubr.msk.bf16.vlgmr.msra.gmra.mrb[8].mxu0 %vm804_vm1, %v1039_v46  ;;  %v859_v46 = vmul.f32 1.442695, %v844_v59  ;;  %v931_v59 = vld [vmem:[#allocation4 + $0x30] sm:$0xff] }
 0x303   : > { %v923_v2 = vmul.f32 1.442695, %v908_v63 }
 0x304   : > { %948 = vadd.xlane.f32.xlu0 %v947_v6 }
 0x305   : > { %1796 = vpow2.f32 %v923_v2 }
 0x306   : > { %1798 = vpow2.f32 %v847_v26 }
 0x307   : > { %v1791_v14 = vpop.eup %1790  ;;  %1800 = vpow2.f32 %v845_v28  ;;  %v1778_v28 = vld [vmem:[%s2257_s7 + $0x20] sm:$0xff]  }
 0x308   : > { %v953_v8 = vsel %vm804_vm1, %v1791_v14, 0.0  ;;  %v1793_v9 = vpop.eup %1792  ;;  %1802 = vpow2.f32 %v849_v0  ;;  %1713 = vmatprep.subr.bf16.mxu1 %v1778_v28 }
 0x309   : > { %954 = vadd.xlane.f32.xlu0 %v953_v8  ;;  %v959_v15 = vsel %vm804_vm1, %v1793_v9, 0.0  ;;  %1804 = vpow2.f32 %v851_v36  ;;  %1714 = vmatpush3.bf16.msra.mxu1 %v1778_v28  ;;  %v1779_v36 = vld [vmem:[%s2257_s7 + $0x28] sm:$0xff]  }
 0x30a   : > { %1806 = vpow2.f32 %v853_v34  ;;  %1715 = vmatprep.subr.bf16.mxu1 %v1779_v36 }
 0x30b   : > { %v1795_v13 = vpop.eup %1794  ;;  %1808 = vpow2.f32 %v855_v25 }
 0x30c   : > { %v956_v16 = vsel %vm804_vm1, %v1795_v13, 0.0  ;;  %v1040_v12 = vpack.c.bf16 %v1795_v13, %v1791_v14  ;;  %1810 = vpow2.f32 %v857_v53 }
 0x30d   : > { %960 = vadd.xlane.f32.xlu0 %v959_v15  ;;  %957 = vadd.xlane.f32.xlu1 %v956_v16  ;;  %1812 = vpow2.f32 %v859_v46 }
 0x30e   : > { %1701 = vmatprep.mubr.msk.bf16.mxu0 %vm804_vm1, %v1040_v12  ;;  %1716 = vmatpush3.bf16.msra.mxu1 %v1779_v36 }
 0x30f   : > { %v1797_v19 = vpop.eup %1796 }
 0x310   : > { %v962_v22 = vsel %vm804_vm1, %v1797_v19, 0.0  ;;  %v1041_v23 = vpack.c.bf16 %v1797_v19, %v1793_v9  ;;  %v1799_v24 = vpop.eup %1798  ;;  %v932_v9 = vld [vmem:[#allocation4 + $0x38] sm:$0xff] }
 0x311   : > { %963 = vadd.xlane.f32.xlu1 %v962_v22  ;;  %v1801_v27 = vpop.eup %1800  ;;  %v934_v48 = vmul.f32 %v1799_v24, %v926_v38 }
 0x312   : > { %1702 = vmatmul.mubr.msk.bf16.gmra.mrb[12].mxu0 %vm804_vm1, %v1041_v23  ;;  %v1803_v29 = vpop.eup %1802  ;;  %v933_v44 = vmul.f32 %v1801_v27, %v925_v42 }
 0x313   : > { %v1805_v31 = vpop.eup %1804  ;;  %v935_v47 = vmul.f32 %v1803_v29, %v927_v55 }
 0x314   : > { %v1807_v30 = vpop.eup %1806  ;;  %v936_v1 = vmul.f32 %v1805_v31, %v928_v49 }
 0x315   : > { %v1809_v35 = vpop.eup %1808  ;;  %v937_v10 = vmul.f32 %v1807_v30, %v929_v56 }
 0x316   : > { %v1811_v52 = vpop.eup %1810  ;;  %v938_v2 = vmul.f32 %v1809_v35, %v930_v61 }
 0x317   : > { %v939_v63 = vmul.f32 %v1811_v52, %v931_v59  ;;  %v1813_v6 = vpop.eup %1812 }
 0x318   : > { %v940_v12 = vmul.f32 %v1813_v6, %v932_v9 }
 0x322   : > { %997 = vperm.xlu1 %1757, %v1799_v24  }
 0x323   : > { %992 = vperm.xlu0 %1756, %v1801_v27   ;;  %v1780_v27 = vld [vmem:[%s2257_s7 + $0x30] sm:$0xff]  }
 0x324   : > { %1717 = vmatprep.subr.bf16.mxu1 %v1780_v27 }
 0x325   : > { %1718 = vmatpush3.bf16.msra.mxu1 %v1780_v27 }
 0x326   : > { %1002 = vperm.xlu1 %1757, %v1803_v29  }
 0x327   : > { %1007 = vperm.xlu0 %1756, %v1805_v31  }
 0x32a   : > { %1012 = vperm.xlu1 %1757, %v1807_v30  }
 0x32b   : > { %1017 = vperm.xlu0 %1756, %v1809_v35   ;;  %v1781_v35 = vld [vmem:[%s2257_s7 + $0x38] sm:$0xff]  }
 0x32c   : > { %1719 = vmatprep.subr.bf16.mxu1 %v1781_v35 }
 0x32d   : > { %1720 = vmatpush3.bf16.msra.mxu1 %v1781_v35 }
 0x386   : > { %v943_v45 = vpop.xlane.xlu1 %942 }
 0x387   : > { %v965_v50 = vadd.f32 %v943_v45, %v933_v44 }
 0x389   : > { %974 = vst.msk [vmem:[#allocation4] sm:$0xff] %vm670_vm0, %v965_v50 }
 0x38a   : > { %v952_v43 = vpop.xlane.xlu1 %951 }
 0x38b   : > { %v968_v3 = vadd.f32 %v952_v43, %v936_v1 }
 0x38d   : > { %977 = vst.msk [vmem:[#allocation4 + $0x18] sm:$0xff] %vm670_vm0, %v968_v3  ;;  %v946_v51 = vpop.xlane.xlu0 %945 }
 0x38e   : > { %v966_v7 = vadd.f32 %v946_v51, %v934_v48 }
 0x390   : > { %975 = vst.msk [vmem:[#allocation4 + $0x8] sm:$0xff] %vm670_vm0, %v966_v7  ;;  %v1186_v19 = vld [vmem:[#allocation4] sm:$0xff] }
 0x391   : > { %v949_v54 = vpop.xlane.xlu0 %948 }
 0x392   : > { %v967_v57 = vadd.f32 %v949_v54, %v935_v47 }
 0x394   : > { %976 = vst.msk [vmem:[#allocation4 + $0x10] sm:$0xff] %vm670_vm0, %v967_v57  ;;  %v1189_v60 = vld [vmem:[#allocation4 + $0x18] sm:$0xff] }
 0x395   : > { %1814 = vrcp.f32 %v1189_v60 }
 0x396   : > { %v955_v58 = vpop.xlane.xlu0 %954 }
 0x397   : > { %v969_v62 = vadd.f32 %v955_v58, %v937_v10  ;;  %v1187_v11 = vld [vmem:[#allocation4 + $0x8] sm:$0xff] }
 0x398   : > { %1816 = vrcp.f32 %v1187_v11 }
 0x399   : > { %978 = vst.msk [vmem:[#allocation4 + $0x20] sm:$0xff] %vm670_vm0, %v969_v62 }
 0x39a   : > { %v961_v14 = vpop.xlane.xlu0 %960  ;;  %v958_v8 = vpop.xlane.xlu1 %957 }
 0x39b   : > { %v971_v13 = vadd.f32 %v961_v14, %v939_v63  ;;  %v970_v15 = vadd.f32 %v958_v8, %v938_v2  ;;  %v1188_v16 = vld [vmem:[#allocation4 + $0x10] sm:$0xff] }
 0x39c   : > { %1818 = vrcp.f32 %v1188_v16 }
 0x39d   : > { %980 = vst.msk [vmem:[#allocation4 + $0x30] sm:$0xff] %vm670_vm0, %v971_v13  ;;  %979 = vst.msk [vmem:[#allocation4 + $0x28] sm:$0xff] %vm670_vm0, %v970_v15  ;;  %1820 = vrcp.f32 %v1186_v19 }
 0x39e   : > { %v964_v22 = vpop.xlane.xlu1 %963 }
 0x39f   : > { %v1815_v23 = vpop.eup %1814  ;;  %v972_v26 = vadd.f32 %v964_v22, %v940_v12 }
 0x3a0   : > { %1219 = vperm.xlu0 %1756, %v1815_v23   ;;  %v1190_v25 = vld [vmem:[#allocation4 + $0x20] sm:$0xff] }
 0x3a1   : > { %981 = vst.msk [vmem:[#allocation4 + $0x38] sm:$0xff] %vm670_vm0, %v972_v26 }
 0x3a2   : > { %v1817_v0 = vpop.eup %1816  ;;  %v993_v43 = vpop.permute.xlu0 %992 }
 0x3a3   : > { %v998_v46 = vpop.permute.xlu1 %997 }
 0x3a4   : > { %1209 = vperm.xlu0 %1756, %v1817_v0   ;;  %v1191_v34 = vld [vmem:[#allocation4 + $0x28] sm:$0xff]  ;;  %v1192_v31 = vld [vmem:[#allocation4 + $0x30] sm:$0xff]  ;;  %v1031_v58 = vmul.f32 0.0, %v998_v46 }
 0x3a5   : > { %1822 = vrcp.f32 %v1191_v34 }
 0x3a6   : > { %v1819_v24 = vpop.eup %1818  ;;  %1824 = vrcp.f32 %v1190_v25  ;;  %v1008_v3 = vpop.permute.xlu0 %1007 }
 0x3a7   : > { %1214 = vperm.xlu1 %1757, %v1819_v24   ;;  %v1821_v30 = vpop.eup %1820  ;;  %v1003_v51 = vpop.permute.xlu1 %1002  ;;  %v1033_v47 = vmul.f32 0.0, %v1008_v3 }
 0x3a8   : > { %1027 = vperm.xlu0 %1756, %v1813_v6   ;;  %v1193_v29 = vld [vmem:[#allocation4 + $0x38] sm:$0xff]  ;;  %v1032_v54 = vmul.f32 0.0, %v1003_v51 }
 0x3a9   : > { %1826 = vrcp.f32 %v1193_v29 }
 0x3aa   : > { %1828 = vrcp.f32 %v1192_v31  ;;  %v1018_v48 = vpop.permute.xlu0 %1017 }
 0x3ab   : > { %1204 = vperm.xlu1 %1757, %v1821_v30   ;;  %v1013_v7 = vpop.permute.xlu1 %1012  ;;  %v1035_v15 = vmul.f32 0.0, %v1018_v48 }
 0x3ac   : > { %v1034_v16 = vmul.f32 0.0, %v1013_v7 }
 0x3af   : > { %v1823_v37 = vpop.eup %1822  ;;  %1022 = vperm.xlu1 %1757, %v1811_v52   ;;  %v1030_v52 = vmul.f32 0.0, %v993_v43 }
 0x3b0   : > { %1229 = vperm.xlu0 %1756, %v1823_v37   ;;  %v1825_v39 = vpop.eup %1824  ;;  %v1594_v37 = vld [vmem:[%s2258_s8] ss:$0 sm:$0xff] }
 0x3b3   : > { %v1827_v40 = vpop.eup %1826  ;;  %1224 = vperm.xlu1 %1757, %v1825_v39  }
 0x3b4   : > { %1239 = vperm.xlu0 %1756, %v1827_v40   ;;  %v1829_v41 = vpop.eup %1828 }
 0x3b7   : > { %1234 = vperm.xlu1 %1757, %v1829_v41  }
 0x3d5   : > { %v1699_v42 = vpop.f32.mrb[8].mxu0 }
 0x3d6   : > { %v1120_v44 = vpop.f32.mrb[9].mxu0  ;;  %v1153_v57 = vadd.f32 %v1699_v42, %v1032_v54 }
 0x3d7   : > { %v1700_v45 = vpop.f32.mrb[10].mxu0  ;;  %v1151_v62 = vadd.f32 %v1120_v44, %v1030_v52 }
 0x3d8   : > { %v1123_v49 = vpop.f32.mrb[11].mxu0  ;;  %v1154_v56 = vadd.f32 %v1700_v45, %v1033_v47 }
 0x3d9   : > { %v1152_v11 = vadd.f32 %v1123_v49, %v1031_v58 }
 0x3e5   : > { %v1703_v50 = vpop.f32.mrb[12].mxu0 }
 0x3e6   : > { %v1136_v53 = vpop.f32.mrb[13].mxu0 }
 0x3e7   : > { %v1704_v1 = vpop.f32.mrb[14].mxu0  ;;  %v1155_v19 = vadd.f32 %v1136_v53, %v1034_v16 }
 0x3e8   : > { %v1139_v38 = vpop.f32.mrb[15].mxu0 }
 0x3e9   : > { %v1156_v22 = vadd.f32 %v1139_v38, %v1035_v15 }
 0x41f   : > { %v1220_v55 = vpop.permute.xlu0 %1219 }
 0x420   : > { %v1245_v59 = vmul.f32 %v1220_v55, %v1154_v56 }
 0x423   : > { %v1210_v60 = vpop.permute.xlu0 %1209 }
 0x424   : > { %v1243_v6 = vmul.f32 %v1210_v60, %v1152_v11 }
 0x426   : > { %v1215_v10 = vpop.permute.xlu1 %1214 }
 0x427   : > { %v1244_v61 = vmul.f32 %v1215_v10, %v1153_v57  ;;  %v1028_v14 = vpop.permute.xlu0 %1027 }
 0x428   : > { %v1037_v23 = vmul.f32 0.0, %v1028_v14 }
 0x429   : > { %v1251_v63 = vpack.c.bf16 %v1245_v59, %v1244_v61 }
 0x42a   : > { %v1205_v2 = vpop.permute.xlu1 %1204  ;;  %v1158_v24 = vadd.f32 %v1704_v1, %v1037_v23 }
 0x42b   : > { %v1242_v8 = vmul.f32 %v1205_v2, %v1151_v62 }
 0x42d   : > { %v1250_v9 = vpack.c.bf16 %v1243_v6, %v1242_v8 }
 0x42e   : > { %v1023_v13 = vpop.permute.xlu1 %1022 }
 0x42f   : > { %v1230_v12 = vpop.permute.xlu0 %1229  ;;  %1721 = vmatprep.mubr.bf16.mxu1 %v1250_v9  ;;  %v1036_v26 = vmul.f32 0.0, %v1023_v13 }
 0x430   : > { %1722 = vmatmul.mubr.bf16.vlgmr.msra.gmra.mrb[8].mxu1 %v1251_v63  ;;  %v1247_v0 = vmul.f32 %v1230_v12, %v1156_v22 }
 0x431   : > { %v1157_v27 = vadd.f32 %v1703_v50, %v1036_v26 }
 0x432   : > { %v1225_v28 = vpop.permute.xlu1 %1224 }
 0x433   : > { %v1246_v36 = vmul.f32 %v1225_v28, %v1155_v19  ;;  %v1240_v34 = vpop.permute.xlu0 %1239 }
 0x434   : > { %v1249_v31 = vmul.f32 %v1240_v34, %v1158_v24 }
 0x435   : > { %v1252_v25 = vpack.c.bf16 %v1247_v0, %v1246_v36 }
 0x436   : > { %v1235_v29 = vpop.permute.xlu1 %1234 }
 0x437   : > { %v1248_v30 = vmul.f32 %v1235_v29, %v1157_v27  ;;  %1725 = vmatprep.mubr.bf16.mxu1 %v1252_v25 }
 0x439   : > { %v1253_v35 = vpack.c.bf16 %v1249_v31, %v1248_v30 }
 0x43b   : > { %1726 = vmatmul.mubr.bf16.gmra.mrb[12].mxu1 %v1253_v35 }
 0x503   : > { %v1723_v39 = vpop.f32.mrb[8].mxu1 }
 0x504   : > { %v1368_v40 = vadd.f32 %v1723_v39, %v1594_v37  ;;  %v1359_v41 = vpop.f32.mrb[9].mxu1 }
 0x505   : > { %v1360_v42 = vadd.f32 %v1594_v37, %v1359_v41  ;;  %v1724_v44 = vpop.f32.mrb[10].mxu1 }
 0x506   : > { %v1400_v45 = vadd.f32 %v1368_v40, %v1983_v17  ;;  %v1371_v49 = vadd.f32 %v1724_v44, %v1594_v37  ;;  %v1362_v50 = vpop.f32.mrb[11].mxu1 }
 0x507   : > { %v1398_v53 = vadd.f32 %v1360_v42, %v1957_v4  ;;  %v1363_v1 = vadd.f32 %v1594_v37, %v1362_v50 }
 0x508   : > { %v1401_v38 = vadd.f32 %v1371_v49, %v1986_v18  ;;  %1408 = vst [vmem:[%s477_s20 + $0x10] sm:$0xff] %v1400_v45 }
 0x509   : > { %v1399_v43 = vadd.f32 %v1363_v1, %v1960_v5  ;;  %1406 = vst [vmem:[%s477_s20] sm:$0xff] %v1398_v53 }
 0x50a   : > { %1409 = vst [vmem:[%s477_s20 + $0x18] sm:$0xff] %v1401_v38 }
 0x50b   : > { %1407 = vst [vmem:[%s477_s20 + $0x8] sm:$0xff] %v1399_v43 }
 0x50e   : > { %v1727_v3 = vpop.f32.mrb[12].mxu1 }
 0x50f   : > { %v1384_v46 = vadd.f32 %v1727_v3, %v1594_v37  ;;  %v1375_v48 = vpop.f32.mrb[13].mxu1 }
 0x510   : > { %v1376_v51 = vadd.f32 %v1594_v37, %v1375_v48  ;;  %v1728_v55 = vpop.f32.mrb[14].mxu1 }
 0x511   : > { %v1404_v17 = vadd.f32 %v1384_v46, %v2006_v32  ;;  %v1387_v7 = vadd.f32 %v1728_v55, %v1594_v37  ;;  %v1378_v47 = vpop.f32.mrb[15].mxu1 }
 0x512   : > { %v1402_v4 = vadd.f32 %v1376_v51, %v1992_v20  ;;  %v1379_v54 = vadd.f32 %v1594_v37, %v1378_v47 }
 0x513   : > { %v1405_v18 = vadd.f32 %v1387_v7, %v2009_v33  ;;  %1412 = vst [vmem:[%s477_s20 + $0x30] sm:$0xff] %v1404_v17 }
 0x514   : > { %v1403_v5 = vadd.f32 %v1379_v54, %v1995_v21  ;;  %1410 = vst [vmem:[%s477_s20 + $0x20] sm:$0xff] %v1402_v4 }
 0x515   : > { %1413 = vst [vmem:[%s477_s20 + $0x38] sm:$0xff] %v1405_v18 }
 0x516   : > { %1411 = vst [vmem:[%s477_s20 + $0x28] sm:$0xff] %v1403_v5 }
 0x517 PF: > { %s19_s11 = sadd.s32 1, %s1852_s11   ;;  %s2260_s30 = smov %s1848_s10 }
 0x518   : > { %p16_p5 = scmp.ge.s32.totalorder %s19_s11, 4   ;;  %s2261_s10 = smov %s2263_s12 }
 0x51a   :  { %18 = sbr.rel (!%p16_p5) target bundleno = 2 (0x2), region = 106 }

</bundles_post_ra>
